<compile_context>
chip_gen: v7x
topology: tpu7x:2x2x1
jax: 0.10.0
libtpu: 0.0.40
codegen_flags: <defaults>
</compile_context>

<pallas_src>
import numpy as np

import jax
import jax.numpy as jnp
from jax.experimental import pallas as pl
from jax.experimental.pallas import tpu as pltpu


# ---------------------------------------------------------------------------
# The fused kernel (one grid step = one sample)
# ---------------------------------------------------------------------------
def _lenet_kernel(x_ref, w1e_ref, w1o_ref, b1_ref, s1e_ref, s1o_ref,
                  w2e_ref, w2o_ref, b2_ref, s2e_ref, s2o_ref,
                  wf1_ref, bf1_ref, wf2_ref, bf2_ref, wf3_ref, bf3_ref, o_ref):
    f32 = jnp.float32
    bf16 = jnp.bfloat16

    x = x_ref[0].astype(bf16)                                    # (32, 32)

    # ---- conv1 (pad=2 applied on host) fused with the width half of the pool:
    # even / odd output columns accumulate independently, then one max. -------
    ce = jnp.dot(x[0:28, :], w1e_ref[0], preferred_element_type=f32)
    co = jnp.dot(x[0:28, :], w1o_ref[0], preferred_element_type=f32)
    for i in range(1, 5):
        xi = x[i:i + 28, :]
        ce = ce + jnp.dot(xi, w1e_ref[i], preferred_element_type=f32)
        co = co + jnp.dot(xi, w1o_ref[i], preferred_element_type=f32)
    # columns ordered (q, c): q in [0,14) pooled col, c in [0,6) channel
    h1 = jnp.maximum(jnp.maximum(ce, co) + b1_ref[...], 0.0).astype(bf16)  # (28, 84)

    # height half of the 2x2 maxpool via two 0/1 row-selection matmuls + max
    p1 = jnp.maximum(
        jnp.dot(s1e_ref[...], h1, preferred_element_type=f32),
        jnp.dot(s1o_ref[...], h1, preferred_element_type=f32)).astype(bf16)  # (14, 84)

    # ---- conv2 fused with width pool (same Toeplitz trick, 6->16 channels) --
    c2e = jnp.dot(p1[0:10, :], w2e_ref[0], preferred_element_type=f32)
    c2o = jnp.dot(p1[0:10, :], w2o_ref[0], preferred_element_type=f32)
    for i in range(1, 5):
        pi = p1[i:i + 10, :]
        c2e = c2e + jnp.dot(pi, w2e_ref[i], preferred_element_type=f32)
        c2o = c2o + jnp.dot(pi, w2o_ref[i], preferred_element_type=f32)
    # columns ordered (u, c): u in [0,5) pooled col, c in [0,16) channel
    h2 = jnp.maximum(jnp.maximum(c2e, c2o) + b2_ref[...], 0.0).astype(bf16)  # (10, 80)

    p2 = jnp.maximum(
        jnp.dot(s2e_ref[...], h2, preferred_element_type=f32),
        jnp.dot(s2o_ref[...], h2, preferred_element_type=f32)).astype(bf16)  # (5, 80)

    # ---- fc1 (400 -> 120): 5 row-block dots, no (5,80)->(1,400) relayout ----
    acc = jnp.dot(p2[0:1, :], wf1_ref[0:80, :], preferred_element_type=f32)
    for h in range(1, 5):
        acc = acc + jnp.dot(p2[h:h + 1, :], wf1_ref[h * 80:(h + 1) * 80, :],
                            preferred_element_type=f32)
    z = jnp.maximum(acc + bf1_ref[...], 0.0).astype(bf16)                    # (1, 120)

    # ---- fc2 + ReLU, (dropout = Identity), fc3 ------------------------------
    z = jnp.maximum(jnp.dot(z, wf2_ref[...], preferred_element_type=f32)
                    + bf2_ref[...], 0.0).astype(bf16)                        # (1, 84)
    z = jnp.dot(z, wf3_ref[...], preferred_element_type=f32) + bf3_ref[...]  # (1, 10)
    o_ref[0] = z.astype(o_ref.dtype)


_PARAM_ORDER = ("w1e", "w1o", "b1", "sel1e", "sel1o",
                "w2e", "w2o", "b2", "sel2e", "sel2o",
                "wf1", "bf1", "wf2", "bf2", "wf3", "bf3")


def _full_spec(arr):
    nd = arr.ndim
    return pl.BlockSpec(arr.shape, lambda b: (0,) * nd)


def lenet_forward(prep, x):
    """x: (B, 1, 28, 28) float32 -> logits (B, 10) float32."""
    B = x.shape[0]
    # Only host-side glue: constant pad=2 (conv1 padding).  ~8 KB.
    xpad = jnp.pad(x[:, 0].astype(jnp.float32), ((0, 0), (2, 2), (2, 2)))   # (B,32,32)

    weights = [prep[k] for k in _PARAM_ORDER]
    out = pl.pallas_call(
        _lenet_kernel,
        out_shape=jax.ShapeDtypeStruct((B, 1, 10), jnp.float32),
        grid=(B,),
        in_specs=[pl.BlockSpec((1, 32, 32), lambda b: (b, 0, 0))]
                 + [_full_spec(w) for w in weights],
        out_specs=pl.BlockSpec((1, 1, 10), lambda b: (b, 0, 0)),
        compiler_params=pltpu.CompilerParams(
            dimension_semantics=("parallel",)),   # 2 TCs on v7x; cheap loop elsewhere
    )(xpad, *weights)
    return out.reshape(B, 10)


# ---------------------------------------------------------------------------
# One-time parameter preparation (PyTorch layout -> kernel layout, bf16)
# ---------------------------------------------------------------------------
def prepare_params(params):
    f32 = np.float32
    bf16 = jnp.bfloat16
    w1 = np.asarray(params["conv1_w"], f32)     # (6, 1, 5, 5)
    w2 = np.asarray(params["conv2_w"], f32)     # (16, 6, 5, 5)

    # conv1 Toeplitz matrices: w1e[i][t, q*6+c] = w1[c,0,i,j] at t = 2q + j
    # (even output columns s=2q); w1o uses t = 2q+1+j (odd columns s=2q+1).
    w1e = np.zeros((5, 32, 14 * 6), f32)
    w1o = np.zeros((5, 32, 14 * 6), f32)
    for i in range(5):
        for q in range(14):
            for j in range(5):
                w1e[i, 2 * q + j,     q * 6:(q + 1) * 6] = w1[:, 0, i, j]
                w1o[i, 2 * q + 1 + j, q * 6:(q + 1) * 6] = w1[:, 0, i, j]

    # conv2 Toeplitz matrices on the (q,cin)-ordered pooled1 columns:
    # w2e[i][(2u+j)*6+cin, u*16+c] = w2[c,cin,i,j]; w2o shifts columns by 1.
    w2e = np.zeros((5, 14 * 6, 5 * 16), f32)
    w2o = np.zeros((5, 14 * 6, 5 * 16), f32)
    for i in range(5):
        for u in range(5):
            for j in range(5):
                blk = w2[:, :, i, j].T          # (cin, cout)
                re = (2 * u + j) * 6
                ro = (2 * u + 1 + j) * 6
                w2e[i, re:re + 6, u * 16:(u + 1) * 16] = blk
                w2o[i, ro:ro + 6, u * 16:(u + 1) * 16] = blk

    # 0/1 row-selection matrices for the height half of the 2x2 maxpool.
    sel1e = np.zeros((14, 28), f32); sel1o = np.zeros((14, 28), f32)
    sel1e[np.arange(14), 2 * np.arange(14)] = 1.0
    sel1o[np.arange(14), 2 * np.arange(14) + 1] = 1.0
    sel2e = np.zeros((5, 10), f32); sel2o = np.zeros((5, 10), f32)
    sel2e[np.arange(5), 2 * np.arange(5)] = 1.0
    sel2o[np.arange(5), 2 * np.arange(5) + 1] = 1.0

    # biases tiled to match the (spatial, channel) column ordering
    b1t = np.tile(np.asarray(params["conv1_b"], f32), 14).reshape(1, 84)
    b2t = np.tile(np.asarray(params["conv2_b"], f32), 5).reshape(1, 80)

    # fc1: torch input order (c, h, w) -> kernel row order (h, w, c)
    wf1 = (np.asarray(params["fc1_w"], f32).reshape(120, 16, 5, 5)
           .transpose(2, 3, 1, 0).reshape(400, 120))
    wf2 = np.asarray(params["fc2_w"], f32).T
    wf3 = np.asarray(params["fc3_w"], f32).T

    return {
        "w1e": jnp.asarray(w1e, bf16), "w1o": jnp.asarray(w1o, bf16),
        "b1": jnp.asarray(b1t, jnp.float32),
        "sel1e": jnp.asarray(sel1e, bf16), "sel1o": jnp.asarray(sel1o, bf16),
        "w2e": jnp.asarray(w2e, bf16), "w2o": jnp.asarray(w2o, bf16),
        "b2": jnp.asarray(b2t, jnp.float32),
        "sel2e": jnp.asarray(sel2e, bf16), "sel2o": jnp.asarray(sel2o, bf16),
        "wf1": jnp.asarray(wf1, bf16),
        "bf1": jnp.asarray(params["fc1_b"], jnp.float32).reshape(1, 120),
        "wf2": jnp.asarray(wf2, bf16),
        "bf2": jnp.asarray(params["fc2_b"], jnp.float32).reshape(1, 84),
        "wf3": jnp.asarray(wf3, bf16),
        "bf3": jnp.asarray(params["fc3_b"], jnp.float32).reshape(1, 10),
    }


# ---------------------------------------------------------------------------
# Pure-JAX f32 reference (matches the PyTorch module) for validation
# ---------------------------------------------------------------------------
def lenet_reference(params, x):
    dn = ("NCHW", "OIHW", "NCHW")
    y = jax.lax.conv_general_dilated(x, params["conv1_w"], (1, 1),
                                     ((2, 2), (2, 2)), dimension_numbers=dn)
    y = jnp.maximum(y + params["conv1_b"][None, :, None, None], 0.0)
    y = jax.lax.reduce_window(y, -jnp.inf, jax.lax.max,
                              (1, 1, 2, 2), (1, 1, 2, 2), "VALID")
    y = jax.lax.conv_general_dilated(y, params["conv2_w"], (1, 1),
                                     ((0, 0), (0, 0)), dimension_numbers=dn)
    y = jnp.maximum(y + params["conv2_b"][None, :, None, None], 0.0)
    y = jax.lax.reduce_window(y, -jnp.inf, jax.lax.max,
                              (1, 1, 2, 2), (1, 1, 2, 2), "VALID")
    y = y.reshape(x.shape[0], 400)
    y = jnp.maximum(y @ params["fc1_w"].T + params["fc1_b"], 0.0)
    y = jnp.maximum(y @ params["fc2_w"].T + params["fc2_b"], 0.0)
    return y @ params["fc3_w"].T + params["fc3_b"]


def init_params(key):
    """Deterministic init mimicking PyTorch's U(-1/sqrt(fan_in), 1/sqrt(fan_in))."""
    def u(k, shape, fan_in):
        bound = 1.0 / jnp.sqrt(fan_in)
        return jax.random.uniform(k, shape, jnp.float32, -bound, bound)

    ks = jax.random.split(key, 10)
    return {
        "conv1_w": u(ks[0], (6, 1, 5, 5), 1 * 5 * 5),
        "conv1_b": u(ks[1], (6,), 1 * 5 * 5),
        "conv2_w": u(ks[2], (16, 6, 5, 5), 6 * 5 * 5),
        "conv2_b": u(ks[3], (16,), 6 * 5 * 5),
        "fc1_w": u(ks[4], (120, 400), 400),
        "fc1_b": u(ks[5], (120,), 400),
        "fc2_w": u(ks[6], (84, 120), 120),
        "fc2_b": u(ks[7], (84,), 120),
        "fc3_w": u(ks[8], (10, 84), 84),
        "fc3_b": u(ks[9], (10,), 84),
    }


if __name__ == "__main__":
    key = jax.random.PRNGKey(0)
    pkey, xkey = jax.random.split(key)
    params = init_params(pkey)
    prep = prepare_params(params)   # one-time weight re-layout + bf16 cast
    # LeNet-5 geometry requires 1x28x28 inputs so the flatten hits 400 features.
    x = jax.random.normal(xkey, (2, 1, 28, 28), jnp.float32)

    out = jax.block_until_ready(jax.jit(lenet_forward)(prep, x))
    assert out.shape == (2, 10), out.shape

    ref = jax.block_until_ready(jax.jit(lenet_reference)(params, x))
    err = float(jnp.max(jnp.abs(out - ref)))
    assert err < 1e-1, f"mismatch vs f32 reference: max abs err {err}"
    print("KERNEL_OK")
</pallas_src>

<mosaic_0001>
module attributes {stable_mosaic.version = 11 : i64} {
  func.func @_lenet_kernel(%arg0: i32, %arg1: memref<1x32x32xf32, #tpu.memory_space<vmem>>, %arg2: memref<5x32x84xbf16, #tpu.memory_space<vmem>>, %arg3: memref<5x32x84xbf16, #tpu.memory_space<vmem>>, %arg4: memref<1x84xf32, #tpu.memory_space<vmem>>, %arg5: memref<14x28xbf16, #tpu.memory_space<vmem>>, %arg6: memref<14x28xbf16, #tpu.memory_space<vmem>>, %arg7: memref<5x84x80xbf16, #tpu.memory_space<vmem>>, %arg8: memref<5x84x80xbf16, #tpu.memory_space<vmem>>, %arg9: memref<1x80xf32, #tpu.memory_space<vmem>>, %arg10: memref<5x10xbf16, #tpu.memory_space<vmem>>, %arg11: memref<5x10xbf16, #tpu.memory_space<vmem>>, %arg12: memref<400x120xbf16, #tpu.memory_space<vmem>>, %arg13: memref<1x120xf32, #tpu.memory_space<vmem>>, %arg14: memref<120x84xbf16, #tpu.memory_space<vmem>>, %arg15: memref<1x84xf32, #tpu.memory_space<vmem>>, %arg16: memref<84x10xbf16, #tpu.memory_space<vmem>>, %arg17: memref<1x10xf32, #tpu.memory_space<vmem>>, %arg18: memref<1x1x10xf32, #tpu.memory_space<vmem>>) attributes {dimension_semantics = [#tpu.dimension_semantics<parallel>], iteration_bounds = array<i64: 2>, scalar_prefetch = 0 : i64, scratch_operands = 0 : i64, tpu.core_type = #tpu.core_type<tc>, window_params = [{transform_indices = @transform_0, window_bounds = array<i64: 1, 32, 32>}, {pipeline_mode = #tpu.pipeline_mode<synchronous>, transform_indices = @transform_1, window_bounds = array<i64: 5, 32, 84>}, {pipeline_mode = #tpu.pipeline_mode<synchronous>, transform_indices = @transform_2, window_bounds = array<i64: 5, 32, 84>}, {pipeline_mode = #tpu.pipeline_mode<synchronous>, transform_indices = @transform_3, window_bounds = array<i64: 1, 84>}, {pipeline_mode = #tpu.pipeline_mode<synchronous>, transform_indices = @transform_4, window_bounds = array<i64: 14, 28>}, {pipeline_mode = #tpu.pipeline_mode<synchronous>, transform_indices = @transform_5, window_bounds = array<i64: 14, 28>}, {pipeline_mode = #tpu.pipeline_mode<synchronous>, transform_indices = @transform_6, window_bounds = array<i64: 5, 84, 80>}, {pipeline_mode = #tpu.pipeline_mode<synchronous>, transform_indices = @transform_7, window_bounds = array<i64: 5, 84, 80>}, {pipeline_mode = #tpu.pipeline_mode<synchronous>, transform_indices = @transform_8, window_bounds = array<i64: 1, 80>}, {pipeline_mode = #tpu.pipeline_mode<synchronous>, transform_indices = @transform_9, window_bounds = array<i64: 5, 10>}, {pipeline_mode = #tpu.pipeline_mode<synchronous>, transform_indices = @transform_10, window_bounds = array<i64: 5, 10>}, {pipeline_mode = #tpu.pipeline_mode<synchronous>, transform_indices = @transform_11, window_bounds = array<i64: 400, 120>}, {pipeline_mode = #tpu.pipeline_mode<synchronous>, transform_indices = @transform_12, window_bounds = array<i64: 1, 120>}, {pipeline_mode = #tpu.pipeline_mode<synchronous>, transform_indices = @transform_13, window_bounds = array<i64: 120, 84>}, {pipeline_mode = #tpu.pipeline_mode<synchronous>, transform_indices = @transform_14, window_bounds = array<i64: 1, 84>}, {pipeline_mode = #tpu.pipeline_mode<synchronous>, transform_indices = @transform_15, window_bounds = array<i64: 84, 10>}, {pipeline_mode = #tpu.pipeline_mode<synchronous>, transform_indices = @transform_16, window_bounds = array<i64: 1, 10>}, {transform_indices = @transform_17, window_bounds = array<i64: 1, 1, 10>}]} {
    %c0 = arith.constant 0 : index
    %c0_0 = arith.constant 0 : index
    %c0_1 = arith.constant 0 : index
    %0 = vector.load %arg1[%c0, %c0_0, %c0_1] : memref<1x32x32xf32, #tpu.memory_space<vmem>>, vector<1x32x32xf32>
    %1 = vector.shape_cast %0 : vector<1x32x32xf32> to vector<32x32xf32>
    %2 = arith.truncf %1 : vector<32x32xf32> to vector<32x32xbf16>
    %3 = vector.extract_strided_slice %2 {offsets = [0, 0], sizes = [28, 32], strides = [1, 1]} : vector<32x32xbf16> to vector<28x32xbf16>
    %c0_2 = arith.constant 0 : index
    %c0_3 = arith.constant 0 : index
    %c0_4 = arith.constant 0 : index
    %4 = vector.load %arg2[%c0_2, %c0_3, %c0_4] : memref<5x32x84xbf16, #tpu.memory_space<vmem>>, vector<1x32x84xbf16>
    %5 = vector.shape_cast %4 : vector<1x32x84xbf16> to vector<32x84xbf16>
    %cst = arith.constant dense<0.000000e+00> : vector<28x84xf32>
    %6 = tpu.matmul %3, %5, %cst {dimension_numbers = #tpu.dot_dimension_numbers<[1], [0], [0], [1], [0, 0, 1, 1], [], []>} : vector<28x32xbf16>, vector<32x84xbf16>, vector<28x84xf32> -> vector<28x84xf32>
    %7 = vector.extract_strided_slice %2 {offsets = [0, 0], sizes = [28, 32], strides = [1, 1]} : vector<32x32xbf16> to vector<28x32xbf16>
    %c0_5 = arith.constant 0 : index
    %c0_6 = arith.constant 0 : index
    %c0_7 = arith.constant 0 : index
    %8 = vector.load %arg3[%c0_5, %c0_6, %c0_7] : memref<5x32x84xbf16, #tpu.memory_space<vmem>>, vector<1x32x84xbf16>
    %9 = vector.shape_cast %8 : vector<1x32x84xbf16> to vector<32x84xbf16>
    %cst_8 = arith.constant dense<0.000000e+00> : vector<28x84xf32>
    %10 = tpu.matmul %7, %9, %cst_8 {dimension_numbers = #tpu.dot_dimension_numbers<[1], [0], [0], [1], [0, 0, 1, 1], [], []>} : vector<28x32xbf16>, vector<32x84xbf16>, vector<28x84xf32> -> vector<28x84xf32>
    %11 = vector.extract_strided_slice %2 {offsets = [1, 0], sizes = [28, 32], strides = [1, 1]} : vector<32x32xbf16> to vector<28x32xbf16>
    %c1 = arith.constant 1 : index
    %c0_9 = arith.constant 0 : index
    %c0_10 = arith.constant 0 : index
    %12 = vector.load %arg2[%c1, %c0_9, %c0_10] : memref<5x32x84xbf16, #tpu.memory_space<vmem>>, vector<1x32x84xbf16>
    %13 = vector.shape_cast %12 : vector<1x32x84xbf16> to vector<32x84xbf16>
    %cst_11 = arith.constant dense<0.000000e+00> : vector<28x84xf32>
    %14 = tpu.matmul %11, %13, %cst_11 {dimension_numbers = #tpu.dot_dimension_numbers<[1], [0], [0], [1], [0, 0, 1, 1], [], []>} : vector<28x32xbf16>, vector<32x84xbf16>, vector<28x84xf32> -> vector<28x84xf32>
    %15 = arith.addf %6, %14 : vector<28x84xf32>
    %c1_12 = arith.constant 1 : index
    %c0_13 = arith.constant 0 : index
    %c0_14 = arith.constant 0 : index
    %16 = vector.load %arg3[%c1_12, %c0_13, %c0_14] : memref<5x32x84xbf16, #tpu.memory_space<vmem>>, vector<1x32x84xbf16>
    %17 = vector.shape_cast %16 : vector<1x32x84xbf16> to vector<32x84xbf16>
    %cst_15 = arith.constant dense<0.000000e+00> : vector<28x84xf32>
    %18 = tpu.matmul %11, %17, %cst_15 {dimension_numbers = #tpu.dot_dimension_numbers<[1], [0], [0], [1], [0, 0, 1, 1], [], []>} : vector<28x32xbf16>, vector<32x84xbf16>, vector<28x84xf32> -> vector<28x84xf32>
    %19 = arith.addf %10, %18 : vector<28x84xf32>
    %20 = vector.extract_strided_slice %2 {offsets = [2, 0], sizes = [28, 32], strides = [1, 1]} : vector<32x32xbf16> to vector<28x32xbf16>
    %c2 = arith.constant 2 : index
    %c0_16 = arith.constant 0 : index
    %c0_17 = arith.constant 0 : index
    %21 = vector.load %arg2[%c2, %c0_16, %c0_17] : memref<5x32x84xbf16, #tpu.memory_space<vmem>>, vector<1x32x84xbf16>
    %22 = vector.shape_cast %21 : vector<1x32x84xbf16> to vector<32x84xbf16>
    %cst_18 = arith.constant dense<0.000000e+00> : vector<28x84xf32>
    %23 = tpu.matmul %20, %22, %cst_18 {dimension_numbers = #tpu.dot_dimension_numbers<[1], [0], [0], [1], [0, 0, 1, 1], [], []>} : vector<28x32xbf16>, vector<32x84xbf16>, vector<28x84xf32> -> vector<28x84xf32>
    %24 = arith.addf %15, %23 : vector<28x84xf32>
    %c2_19 = arith.constant 2 : index
    %c0_20 = arith.constant 0 : index
    %c0_21 = arith.constant 0 : index
    %25 = vector.load %arg3[%c2_19, %c0_20, %c0_21] : memref<5x32x84xbf16, #tpu.memory_space<vmem>>, vector<1x32x84xbf16>
    %26 = vector.shape_cast %25 : vector<1x32x84xbf16> to vector<32x84xbf16>
    %cst_22 = arith.constant dense<0.000000e+00> : vector<28x84xf32>
    %27 = tpu.matmul %20, %26, %cst_22 {dimension_numbers = #tpu.dot_dimension_numbers<[1], [0], [0], [1], [0, 0, 1, 1], [], []>} : vector<28x32xbf16>, vector<32x84xbf16>, vector<28x84xf32> -> vector<28x84xf32>
    %28 = arith.addf %19, %27 : vector<28x84xf32>
    %29 = vector.extract_strided_slice %2 {offsets = [3, 0], sizes = [28, 32], strides = [1, 1]} : vector<32x32xbf16> to vector<28x32xbf16>
    %c3 = arith.constant 3 : index
    %c0_23 = arith.constant 0 : index
    %c0_24 = arith.constant 0 : index
    %30 = vector.load %arg2[%c3, %c0_23, %c0_24] : memref<5x32x84xbf16, #tpu.memory_space<vmem>>, vector<1x32x84xbf16>
    %31 = vector.shape_cast %30 : vector<1x32x84xbf16> to vector<32x84xbf16>
    %cst_25 = arith.constant dense<0.000000e+00> : vector<28x84xf32>
    %32 = tpu.matmul %29, %31, %cst_25 {dimension_numbers = #tpu.dot_dimension_numbers<[1], [0], [0], [1], [0, 0, 1, 1], [], []>} : vector<28x32xbf16>, vector<32x84xbf16>, vector<28x84xf32> -> vector<28x84xf32>
    %33 = arith.addf %24, %32 : vector<28x84xf32>
    %c3_26 = arith.constant 3 : index
    %c0_27 = arith.constant 0 : index
    %c0_28 = arith.constant 0 : index
    %34 = vector.load %arg3[%c3_26, %c0_27, %c0_28] : memref<5x32x84xbf16, #tpu.memory_space<vmem>>, vector<1x32x84xbf16>
    %35 = vector.shape_cast %34 : vector<1x32x84xbf16> to vector<32x84xbf16>
    %cst_29 = arith.constant dense<0.000000e+00> : vector<28x84xf32>
    %36 = tpu.matmul %29, %35, %cst_29 {dimension_numbers = #tpu.dot_dimension_numbers<[1], [0], [0], [1], [0, 0, 1, 1], [], []>} : vector<28x32xbf16>, vector<32x84xbf16>, vector<28x84xf32> -> vector<28x84xf32>
    %37 = arith.addf %28, %36 : vector<28x84xf32>
    %38 = vector.extract_strided_slice %2 {offsets = [4, 0], sizes = [28, 32], strides = [1, 1]} : vector<32x32xbf16> to vector<28x32xbf16>
    %c4 = arith.constant 4 : index
    %c0_30 = arith.constant 0 : index
    %c0_31 = arith.constant 0 : index
    %39 = vector.load %arg2[%c4, %c0_30, %c0_31] : memref<5x32x84xbf16, #tpu.memory_space<vmem>>, vector<1x32x84xbf16>
    %40 = vector.shape_cast %39 : vector<1x32x84xbf16> to vector<32x84xbf16>
    %cst_32 = arith.constant dense<0.000000e+00> : vector<28x84xf32>
    %41 = tpu.matmul %38, %40, %cst_32 {dimension_numbers = #tpu.dot_dimension_numbers<[1], [0], [0], [1], [0, 0, 1, 1], [], []>} : vector<28x32xbf16>, vector<32x84xbf16>, vector<28x84xf32> -> vector<28x84xf32>
    %42 = arith.addf %33, %41 : vector<28x84xf32>
    %c4_33 = arith.constant 4 : index
    %c0_34 = arith.constant 0 : index
    %c0_35 = arith.constant 0 : index
    %43 = vector.load %arg3[%c4_33, %c0_34, %c0_35] : memref<5x32x84xbf16, #tpu.memory_space<vmem>>, vector<1x32x84xbf16>
    %44 = vector.shape_cast %43 : vector<1x32x84xbf16> to vector<32x84xbf16>
    %cst_36 = arith.constant dense<0.000000e+00> : vector<28x84xf32>
    %45 = tpu.matmul %38, %44, %cst_36 {dimension_numbers = #tpu.dot_dimension_numbers<[1], [0], [0], [1], [0, 0, 1, 1], [], []>} : vector<28x32xbf16>, vector<32x84xbf16>, vector<28x84xf32> -> vector<28x84xf32>
    %46 = arith.addf %37, %45 : vector<28x84xf32>
    %47 = arith.maximumf %42, %46 : vector<28x84xf32>
    %c0_37 = arith.constant 0 : index
    %c0_38 = arith.constant 0 : index
    %48 = vector.load %arg4[%c0_37, %c0_38] : memref<1x84xf32, #tpu.memory_space<vmem>>, vector<1x84xf32>
    %49 = vector.broadcast %48 : vector<1x84xf32> to vector<28x84xf32>
    %50 = arith.addf %47, %49 : vector<28x84xf32>
    %cst_39 = arith.constant 0.000000e+00 : f32
    %51 = vector.broadcast %cst_39 : f32 to vector<28x84xf32>
    %52 = arith.maximumf %50, %51 : vector<28x84xf32>
    %53 = arith.truncf %52 : vector<28x84xf32> to vector<28x84xbf16>
    %c0_40 = arith.constant 0 : index
    %c0_41 = arith.constant 0 : index
    %54 = vector.load %arg5[%c0_40, %c0_41] : memref<14x28xbf16, #tpu.memory_space<vmem>>, vector<14x28xbf16>
    %cst_42 = arith.constant dense<0.000000e+00> : vector<14x84xf32>
    %55 = tpu.matmul %54, %53, %cst_42 {dimension_numbers = #tpu.dot_dimension_numbers<[1], [0], [0], [1], [0, 0, 1, 1], [], []>} : vector<14x28xbf16>, vector<28x84xbf16>, vector<14x84xf32> -> vector<14x84xf32>
    %c0_43 = arith.constant 0 : index
    %c0_44 = arith.constant 0 : index
    %56 = vector.load %arg6[%c0_43, %c0_44] : memref<14x28xbf16, #tpu.memory_space<vmem>>, vector<14x28xbf16>
    %cst_45 = arith.constant dense<0.000000e+00> : vector<14x84xf32>
    %57 = tpu.matmul %56, %53, %cst_45 {dimension_numbers = #tpu.dot_dimension_numbers<[1], [0], [0], [1], [0, 0, 1, 1], [], []>} : vector<14x28xbf16>, vector<28x84xbf16>, vector<14x84xf32> -> vector<14x84xf32>
    %58 = arith.maximumf %55, %57 : vector<14x84xf32>
    %59 = arith.truncf %58 : vector<14x84xf32> to vector<14x84xbf16>
    %60 = vector.extract_strided_slice %59 {offsets = [0, 0], sizes = [10, 84], strides = [1, 1]} : vector<14x84xbf16> to vector<10x84xbf16>
    %c0_46 = arith.constant 0 : index
    %c0_47 = arith.constant 0 : index
    %c0_48 = arith.constant 0 : index
    %61 = vector.load %arg7[%c0_46, %c0_47, %c0_48] : memref<5x84x80xbf16, #tpu.memory_space<vmem>>, vector<1x84x80xbf16>
    %62 = vector.shape_cast %61 : vector<1x84x80xbf16> to vector<84x80xbf16>
    %cst_49 = arith.constant dense<0.000000e+00> : vector<10x80xf32>
    %63 = tpu.matmul %60, %62, %cst_49 {dimension_numbers = #tpu.dot_dimension_numbers<[1], [0], [0], [1], [0, 0, 1, 1], [], []>} : vector<10x84xbf16>, vector<84x80xbf16>, vector<10x80xf32> -> vector<10x80xf32>
    %64 = vector.extract_strided_slice %59 {offsets = [0, 0], sizes = [10, 84], strides = [1, 1]} : vector<14x84xbf16> to vector<10x84xbf16>
    %c0_50 = arith.constant 0 : index
    %c0_51 = arith.constant 0 : index
    %c0_52 = arith.constant 0 : index
    %65 = vector.load %arg8[%c0_50, %c0_51, %c0_52] : memref<5x84x80xbf16, #tpu.memory_space<vmem>>, vector<1x84x80xbf16>
    %66 = vector.shape_cast %65 : vector<1x84x80xbf16> to vector<84x80xbf16>
    %cst_53 = arith.constant dense<0.000000e+00> : vector<10x80xf32>
    %67 = tpu.matmul %64, %66, %cst_53 {dimension_numbers = #tpu.dot_dimension_numbers<[1], [0], [0], [1], [0, 0, 1, 1], [], []>} : vector<10x84xbf16>, vector<84x80xbf16>, vector<10x80xf32> -> vector<10x80xf32>
    %68 = vector.extract_strided_slice %59 {offsets = [1, 0], sizes = [10, 84], strides = [1, 1]} : vector<14x84xbf16> to vector<10x84xbf16>
    %c1_54 = arith.constant 1 : index
    %c0_55 = arith.constant 0 : index
    %c0_56 = arith.constant 0 : index
    %69 = vector.load %arg7[%c1_54, %c0_55, %c0_56] : memref<5x84x80xbf16, #tpu.memory_space<vmem>>, vector<1x84x80xbf16>
    %70 = vector.shape_cast %69 : vector<1x84x80xbf16> to vector<84x80xbf16>
    %cst_57 = arith.constant dense<0.000000e+00> : vector<10x80xf32>
    %71 = tpu.matmul %68, %70, %cst_57 {dimension_numbers = #tpu.dot_dimension_numbers<[1], [0], [0], [1], [0, 0, 1, 1], [], []>} : vector<10x84xbf16>, vector<84x80xbf16>, vector<10x80xf32> -> vector<10x80xf32>
    %72 = arith.addf %63, %71 : vector<10x80xf32>
    %c1_58 = arith.constant 1 : index
    %c0_59 = arith.constant 0 : index
    %c0_60 = arith.constant 0 : index
    %73 = vector.load %arg8[%c1_58, %c0_59, %c0_60] : memref<5x84x80xbf16, #tpu.memory_space<vmem>>, vector<1x84x80xbf16>
    %74 = vector.shape_cast %73 : vector<1x84x80xbf16> to vector<84x80xbf16>
    %cst_61 = arith.constant dense<0.000000e+00> : vector<10x80xf32>
    %75 = tpu.matmul %68, %74, %cst_61 {dimension_numbers = #tpu.dot_dimension_numbers<[1], [0], [0], [1], [0, 0, 1, 1], [], []>} : vector<10x84xbf16>, vector<84x80xbf16>, vector<10x80xf32> -> vector<10x80xf32>
    %76 = arith.addf %67, %75 : vector<10x80xf32>
    %77 = vector.extract_strided_slice %59 {offsets = [2, 0], sizes = [10, 84], strides = [1, 1]} : vector<14x84xbf16> to vector<10x84xbf16>
    %c2_62 = arith.constant 2 : index
    %c0_63 = arith.constant 0 : index
    %c0_64 = arith.constant 0 : index
    %78 = vector.load %arg7[%c2_62, %c0_63, %c0_64] : memref<5x84x80xbf16, #tpu.memory_space<vmem>>, vector<1x84x80xbf16>
    %79 = vector.shape_cast %78 : vector<1x84x80xbf16> to vector<84x80xbf16>
    %cst_65 = arith.constant dense<0.000000e+00> : vector<10x80xf32>
    %80 = tpu.matmul %77, %79, %cst_65 {dimension_numbers = #tpu.dot_dimension_numbers<[1], [0], [0], [1], [0, 0, 1, 1], [], []>} : vector<10x84xbf16>, vector<84x80xbf16>, vector<10x80xf32> -> vector<10x80xf32>
    %81 = arith.addf %72, %80 : vector<10x80xf32>
    %c2_66 = arith.constant 2 : index
    %c0_67 = arith.constant 0 : index
    %c0_68 = arith.constant 0 : index
    %82 = vector.load %arg8[%c2_66, %c0_67, %c0_68] : memref<5x84x80xbf16, #tpu.memory_space<vmem>>, vector<1x84x80xbf16>
    %83 = vector.shape_cast %82 : vector<1x84x80xbf16> to vector<84x80xbf16>
    %cst_69 = arith.constant dense<0.000000e+00> : vector<10x80xf32>
    %84 = tpu.matmul %77, %83, %cst_69 {dimension_numbers = #tpu.dot_dimension_numbers<[1], [0], [0], [1], [0, 0, 1, 1], [], []>} : vector<10x84xbf16>, vector<84x80xbf16>, vector<10x80xf32> -> vector<10x80xf32>
    %85 = arith.addf %76, %84 : vector<10x80xf32>
    %86 = vector.extract_strided_slice %59 {offsets = [3, 0], sizes = [10, 84], strides = [1, 1]} : vector<14x84xbf16> to vector<10x84xbf16>
    %c3_70 = arith.constant 3 : index
    %c0_71 = arith.constant 0 : index
    %c0_72 = arith.constant 0 : index
    %87 = vector.load %arg7[%c3_70, %c0_71, %c0_72] : memref<5x84x80xbf16, #tpu.memory_space<vmem>>, vector<1x84x80xbf16>
    %88 = vector.shape_cast %87 : vector<1x84x80xbf16> to vector<84x80xbf16>
    %cst_73 = arith.constant dense<0.000000e+00> : vector<10x80xf32>
    %89 = tpu.matmul %86, %88, %cst_73 {dimension_numbers = #tpu.dot_dimension_numbers<[1], [0], [0], [1], [0, 0, 1, 1], [], []>} : vector<10x84xbf16>, vector<84x80xbf16>, vector<10x80xf32> -> vector<10x80xf32>
    %90 = arith.addf %81, %89 : vector<10x80xf32>
    %c3_74 = arith.constant 3 : index
    %c0_75 = arith.constant 0 : index
    %c0_76 = arith.constant 0 : index
    %91 = vector.load %arg8[%c3_74, %c0_75, %c0_76] : memref<5x84x80xbf16, #tpu.memory_space<vmem>>, vector<1x84x80xbf16>
    %92 = vector.shape_cast %91 : vector<1x84x80xbf16> to vector<84x80xbf16>
    %cst_77 = arith.constant dense<0.000000e+00> : vector<10x80xf32>
    %93 = tpu.matmul %86, %92, %cst_77 {dimension_numbers = #tpu.dot_dimension_numbers<[1], [0], [0], [1], [0, 0, 1, 1], [], []>} : vector<10x84xbf16>, vector<84x80xbf16>, vector<10x80xf32> -> vector<10x80xf32>
    %94 = arith.addf %85, %93 : vector<10x80xf32>
    %95 = vector.extract_strided_slice %59 {offsets = [4, 0], sizes = [10, 84], strides = [1, 1]} : vector<14x84xbf16> to vector<10x84xbf16>
    %c4_78 = arith.constant 4 : index
    %c0_79 = arith.constant 0 : index
    %c0_80 = arith.constant 0 : index
    %96 = vector.load %arg7[%c4_78, %c0_79, %c0_80] : memref<5x84x80xbf16, #tpu.memory_space<vmem>>, vector<1x84x80xbf16>
    %97 = vector.shape_cast %96 : vector<1x84x80xbf16> to vector<84x80xbf16>
    %cst_81 = arith.constant dense<0.000000e+00> : vector<10x80xf32>
    %98 = tpu.matmul %95, %97, %cst_81 {dimension_numbers = #tpu.dot_dimension_numbers<[1], [0], [0], [1], [0, 0, 1, 1], [], []>} : vector<10x84xbf16>, vector<84x80xbf16>, vector<10x80xf32> -> vector<10x80xf32>
    %99 = arith.addf %90, %98 : vector<10x80xf32>
    %c4_82 = arith.constant 4 : index
    %c0_83 = arith.constant 0 : index
    %c0_84 = arith.constant 0 : index
    %100 = vector.load %arg8[%c4_82, %c0_83, %c0_84] : memref<5x84x80xbf16, #tpu.memory_space<vmem>>, vector<1x84x80xbf16>
    %101 = vector.shape_cast %100 : vector<1x84x80xbf16> to vector<84x80xbf16>
    %cst_85 = arith.constant dense<0.000000e+00> : vector<10x80xf32>
    %102 = tpu.matmul %95, %101, %cst_85 {dimension_numbers = #tpu.dot_dimension_numbers<[1], [0], [0], [1], [0, 0, 1, 1], [], []>} : vector<10x84xbf16>, vector<84x80xbf16>, vector<10x80xf32> -> vector<10x80xf32>
    %103 = arith.addf %94, %102 : vector<10x80xf32>
    %104 = arith.maximumf %99, %103 : vector<10x80xf32>
    %c0_86 = arith.constant 0 : index
    %c0_87 = arith.constant 0 : index
    %105 = vector.load %arg9[%c0_86, %c0_87] : memref<1x80xf32, #tpu.memory_space<vmem>>, vector<1x80xf32>
    %106 = vector.broadcast %105 : vector<1x80xf32> to vector<10x80xf32>
    %107 = arith.addf %104, %106 : vector<10x80xf32>
    %cst_88 = arith.constant 0.000000e+00 : f32
    %108 = vector.broadcast %cst_88 : f32 to vector<10x80xf32>
    %109 = arith.maximumf %107, %108 : vector<10x80xf32>
    %110 = arith.truncf %109 : vector<10x80xf32> to vector<10x80xbf16>
    %c0_89 = arith.constant 0 : index
    %c0_90 = arith.constant 0 : index
    %111 = vector.load %arg10[%c0_89, %c0_90] : memref<5x10xbf16, #tpu.memory_space<vmem>>, vector<5x10xbf16>
    %cst_91 = arith.constant dense<0.000000e+00> : vector<5x80xf32>
    %112 = tpu.matmul %111, %110, %cst_91 {dimension_numbers = #tpu.dot_dimension_numbers<[1], [0], [0], [1], [0, 0, 1, 1], [], []>} : vector<5x10xbf16>, vector<10x80xbf16>, vector<5x80xf32> -> vector<5x80xf32>
    %c0_92 = arith.constant 0 : index
    %c0_93 = arith.constant 0 : index
    %113 = vector.load %arg11[%c0_92, %c0_93] : memref<5x10xbf16, #tpu.memory_space<vmem>>, vector<5x10xbf16>
    %cst_94 = arith.constant dense<0.000000e+00> : vector<5x80xf32>
    %114 = tpu.matmul %113, %110, %cst_94 {dimension_numbers = #tpu.dot_dimension_numbers<[1], [0], [0], [1], [0, 0, 1, 1], [], []>} : vector<5x10xbf16>, vector<10x80xbf16>, vector<5x80xf32> -> vector<5x80xf32>
    %115 = arith.maximumf %112, %114 : vector<5x80xf32>
    %116 = arith.truncf %115 : vector<5x80xf32> to vector<5x80xbf16>
    %117 = vector.extract_strided_slice %116 {offsets = [0, 0], sizes = [1, 80], strides = [1, 1]} : vector<5x80xbf16> to vector<1x80xbf16>
    %c0_95 = arith.constant 0 : index
    %c0_96 = arith.constant 0 : index
    %118 = vector.load %arg12[%c0_95, %c0_96] : memref<400x120xbf16, #tpu.memory_space<vmem>>, vector<80x120xbf16>
    %cst_97 = arith.constant dense<0.000000e+00> : vector<1x120xf32>
    %119 = tpu.matmul %117, %118, %cst_97 {dimension_numbers = #tpu.dot_dimension_numbers<[1], [0], [0], [1], [0, 0, 1, 1], [], []>} : vector<1x80xbf16>, vector<80x120xbf16>, vector<1x120xf32> -> vector<1x120xf32>
    %120 = vector.extract_strided_slice %116 {offsets = [1, 0], sizes = [1, 80], strides = [1, 1]} : vector<5x80xbf16> to vector<1x80xbf16>
    %c80 = arith.constant 80 : index
    %c0_98 = arith.constant 0 : index
    %121 = vector.load %arg12[%c80, %c0_98] : memref<400x120xbf16, #tpu.memory_space<vmem>>, vector<80x120xbf16>
    %cst_99 = arith.constant dense<0.000000e+00> : vector<1x120xf32>
    %122 = tpu.matmul %120, %121, %cst_99 {dimension_numbers = #tpu.dot_dimension_numbers<[1], [0], [0], [1], [0, 0, 1, 1], [], []>} : vector<1x80xbf16>, vector<80x120xbf16>, vector<1x120xf32> -> vector<1x120xf32>
    %123 = arith.addf %119, %122 : vector<1x120xf32>
    %124 = vector.extract_strided_slice %116 {offsets = [2, 0], sizes = [1, 80], strides = [1, 1]} : vector<5x80xbf16> to vector<1x80xbf16>
    %c160 = arith.constant 160 : index
    %c0_100 = arith.constant 0 : index
    %125 = vector.load %arg12[%c160, %c0_100] : memref<400x120xbf16, #tpu.memory_space<vmem>>, vector<80x120xbf16>
    %cst_101 = arith.constant dense<0.000000e+00> : vector<1x120xf32>
    %126 = tpu.matmul %124, %125, %cst_101 {dimension_numbers = #tpu.dot_dimension_numbers<[1], [0], [0], [1], [0, 0, 1, 1], [], []>} : vector<1x80xbf16>, vector<80x120xbf16>, vector<1x120xf32> -> vector<1x120xf32>
    %127 = arith.addf %123, %126 : vector<1x120xf32>
    %128 = vector.extract_strided_slice %116 {offsets = [3, 0], sizes = [1, 80], strides = [1, 1]} : vector<5x80xbf16> to vector<1x80xbf16>
    %c240 = arith.constant 240 : index
    %c0_102 = arith.constant 0 : index
    %129 = vector.load %arg12[%c240, %c0_102] : memref<400x120xbf16, #tpu.memory_space<vmem>>, vector<80x120xbf16>
    %cst_103 = arith.constant dense<0.000000e+00> : vector<1x120xf32>
    %130 = tpu.matmul %128, %129, %cst_103 {dimension_numbers = #tpu.dot_dimension_numbers<[1], [0], [0], [1], [0, 0, 1, 1], [], []>} : vector<1x80xbf16>, vector<80x120xbf16>, vector<1x120xf32> -> vector<1x120xf32>
    %131 = arith.addf %127, %130 : vector<1x120xf32>
    %132 = vector.extract_strided_slice %116 {offsets = [4, 0], sizes = [1, 80], strides = [1, 1]} : vector<5x80xbf16> to vector<1x80xbf16>
    %c320 = arith.constant 320 : index
    %c0_104 = arith.constant 0 : index
    %133 = vector.load %arg12[%c320, %c0_104] : memref<400x120xbf16, #tpu.memory_space<vmem>>, vector<80x120xbf16>
    %cst_105 = arith.constant dense<0.000000e+00> : vector<1x120xf32>
    %134 = tpu.matmul %132, %133, %cst_105 {dimension_numbers = #tpu.dot_dimension_numbers<[1], [0], [0], [1], [0, 0, 1, 1], [], []>} : vector<1x80xbf16>, vector<80x120xbf16>, vector<1x120xf32> -> vector<1x120xf32>
    %135 = arith.addf %131, %134 : vector<1x120xf32>
    %c0_106 = arith.constant 0 : index
    %c0_107 = arith.constant 0 : index
    %136 = vector.load %arg13[%c0_106, %c0_107] : memref<1x120xf32, #tpu.memory_space<vmem>>, vector<1x120xf32>
    %137 = arith.addf %135, %136 : vector<1x120xf32>
    %cst_108 = arith.constant 0.000000e+00 : f32
    %138 = vector.broadcast %cst_108 : f32 to vector<1x120xf32>
    %139 = arith.maximumf %137, %138 : vector<1x120xf32>
    %140 = arith.truncf %139 : vector<1x120xf32> to vector<1x120xbf16>
    %c0_109 = arith.constant 0 : index
    %c0_110 = arith.constant 0 : index
    %141 = vector.load %arg14[%c0_109, %c0_110] : memref<120x84xbf16, #tpu.memory_space<vmem>>, vector<120x84xbf16>
    %cst_111 = arith.constant dense<0.000000e+00> : vector<1x84xf32>
    %142 = tpu.matmul %140, %141, %cst_111 {dimension_numbers = #tpu.dot_dimension_numbers<[1], [0], [0], [1], [0, 0, 1, 1], [], []>} : vector<1x120xbf16>, vector<120x84xbf16>, vector<1x84xf32> -> vector<1x84xf32>
    %c0_112 = arith.constant 0 : index
    %c0_113 = arith.constant 0 : index
    %143 = vector.load %arg15[%c0_112, %c0_113] : memref<1x84xf32, #tpu.memory_space<vmem>>, vector<1x84xf32>
    %144 = arith.addf %142, %143 : vector<1x84xf32>
    %cst_114 = arith.constant 0.000000e+00 : f32
    %145 = vector.broadcast %cst_114 : f32 to vector<1x84xf32>
    %146 = arith.maximumf %144, %145 : vector<1x84xf32>
    %147 = arith.truncf %146 : vector<1x84xf32> to vector<1x84xbf16>
    %c0_115 = arith.constant 0 : index
    %c0_116 = arith.constant 0 : index
    %148 = vector.load %arg16[%c0_115, %c0_116] : memref<84x10xbf16, #tpu.memory_space<vmem>>, vector<84x10xbf16>
    %cst_117 = arith.constant dense<0.000000e+00> : vector<1x10xf32>
    %149 = tpu.matmul %147, %148, %cst_117 {dimension_numbers = #tpu.dot_dimension_numbers<[1], [0], [0], [1], [0, 0, 1, 1], [], []>} : vector<1x84xbf16>, vector<84x10xbf16>, vector<1x10xf32> -> vector<1x10xf32>
    %c0_118 = arith.constant 0 : index
    %c0_119 = arith.constant 0 : index
    %150 = vector.load %arg17[%c0_118, %c0_119] : memref<1x10xf32, #tpu.memory_space<vmem>>, vector<1x10xf32>
    %151 = arith.addf %149, %150 : vector<1x10xf32>
    %c0_120 = arith.constant 0 : index
    %c0_121 = arith.constant 0 : index
    %c0_122 = arith.constant 0 : index
    %152 = vector.load %arg18[%c0_120, %c0_121, %c0_122] : memref<1x1x10xf32, #tpu.memory_space<vmem>>, vector<1x1x10xf32>
    %153 = vector.shape_cast %152 : vector<1x1x10xf32> to vector<1x10xf32>
    %154 = vector.shape_cast %151 : vector<1x10xf32> to vector<1x1x10xf32>
    tpu.vector_store %arg18[%c0_120, %c0_121, %c0_122], %154 {strides = array<i32>} : memref<1x1x10xf32, #tpu.memory_space<vmem>>, vector<1x1x10xf32>,
    return
  }
  func.func @transform_0(%arg0: i32) -> (i32, i32, i32) {
    %c0_i32 = arith.constant 0 : i32
    %c0_i32_0 = arith.constant 0 : i32
    %c0_i32_1 = arith.constant 0 : i32
    return %arg0, %c0_i32, %c0_i32_0 : i32, i32, i32
  }
  func.func @transform_1(%arg0: i32) -> (i32, i32, i32) {
    %c0_i32 = arith.constant 0 : i32
    %c0_i32_0 = arith.constant 0 : i32
    %c0_i32_1 = arith.constant 0 : i32
    %c0_i32_2 = arith.constant 0 : i32
    return %c0_i32, %c0_i32_0, %c0_i32_1 : i32, i32, i32
  }
  func.func @transform_2(%arg0: i32) -> (i32, i32, i32) {
    %c0_i32 = arith.constant 0 : i32
    %c0_i32_0 = arith.constant 0 : i32
    %c0_i32_1 = arith.constant 0 : i32
    %c0_i32_2 = arith.constant 0 : i32
    return %c0_i32, %c0_i32_0, %c0_i32_1 : i32, i32, i32
  }
  func.func @transform_3(%arg0: i32) -> (i32, i32) {
    %c0_i32 = arith.constant 0 : i32
    %c0_i32_0 = arith.constant 0 : i32
    %c0_i32_1 = arith.constant 0 : i32
    return %c0_i32, %c0_i32_0 : i32, i32
  }
  func.func @transform_4(%arg0: i32) -> (i32, i32) {
    %c0_i32 = arith.constant 0 : i32
    %c0_i32_0 = arith.constant 0 : i32
    %c0_i32_1 = arith.constant 0 : i32
    return %c0_i32, %c0_i32_0 : i32, i32
  }
  func.func @transform_5(%arg0: i32) -> (i32, i32) {
    %c0_i32 = arith.constant 0 : i32
    %c0_i32_0 = arith.constant 0 : i32
    %c0_i32_1 = arith.constant 0 : i32
    return %c0_i32, %c0_i32_0 : i32, i32
  }
  func.func @transform_6(%arg0: i32) -> (i32, i32, i32) {
    %c0_i32 = arith.constant 0 : i32
    %c0_i32_0 = arith.constant 0 : i32
    %c0_i32_1 = arith.constant 0 : i32
    %c0_i32_2 = arith.constant 0 : i32
    return %c0_i32, %c0_i32_0, %c0_i32_1 : i32, i32, i32
  }
  func.func @transform_7(%arg0: i32) -> (i32, i32, i32) {
    %c0_i32 = arith.constant 0 : i32
    %c0_i32_0 = arith.constant 0 : i32
    %c0_i32_1 = arith.constant 0 : i32
    %c0_i32_2 = arith.constant 0 : i32
    return %c0_i32, %c0_i32_0, %c0_i32_1 : i32, i32, i32
  }
  func.func @transform_8(%arg0: i32) -> (i32, i32) {
    %c0_i32 = arith.constant 0 : i32
    %c0_i32_0 = arith.constant 0 : i32
    %c0_i32_1 = arith.constant 0 : i32
    return %c0_i32, %c0_i32_0 : i32, i32
  }
  func.func @transform_9(%arg0: i32) -> (i32, i32) {
    %c0_i32 = arith.constant 0 : i32
    %c0_i32_0 = arith.constant 0 : i32
    %c0_i32_1 = arith.constant 0 : i32
    return %c0_i32, %c0_i32_0 : i32, i32
  }
  func.func @transform_10(%arg0: i32) -> (i32, i32) {
    %c0_i32 = arith.constant 0 : i32
    %c0_i32_0 = arith.constant 0 : i32
    %c0_i32_1 = arith.constant 0 : i32
    return %c0_i32, %c0_i32_0 : i32, i32
  }
  func.func @transform_11(%arg0: i32) -> (i32, i32) {
    %c0_i32 = arith.constant 0 : i32
    %c0_i32_0 = arith.constant 0 : i32
    %c0_i32_1 = arith.constant 0 : i32
    return %c0_i32, %c0_i32_0 : i32, i32
  }
  func.func @transform_12(%arg0: i32) -> (i32, i32) {
    %c0_i32 = arith.constant 0 : i32
    %c0_i32_0 = arith.constant 0 : i32
    %c0_i32_1 = arith.constant 0 : i32
    return %c0_i32, %c0_i32_0 : i32, i32
  }
  func.func @transform_13(%arg0: i32) -> (i32, i32) {
    %c0_i32 = arith.constant 0 : i32
    %c0_i32_0 = arith.constant 0 : i32
    %c0_i32_1 = arith.constant 0 : i32
    return %c0_i32, %c0_i32_0 : i32, i32
  }
  func.func @transform_14(%arg0: i32) -> (i32, i32) {
    %c0_i32 = arith.constant 0 : i32
    %c0_i32_0 = arith.constant 0 : i32
    %c0_i32_1 = arith.constant 0 : i32
    return %c0_i32, %c0_i32_0 : i32, i32
  }
  func.func @transform_15(%arg0: i32) -> (i32, i32) {
    %c0_i32 = arith.constant 0 : i32
    %c0_i32_0 = arith.constant 0 : i32
    %c0_i32_1 = arith.constant 0 : i32
    return %c0_i32, %c0_i32_0 : i32, i32
  }
  func.func @transform_16(%arg0: i32) -> (i32, i32) {
    %c0_i32 = arith.constant 0 : i32
    %c0_i32_0 = arith.constant 0 : i32
    %c0_i32_1 = arith.constant 0 : i32
    return %c0_i32, %c0_i32_0 : i32, i32
  }
  func.func @transform_17(%arg0: i32) -> (i32, i32, i32) {
    %c0_i32 = arith.constant 0 : i32
    %c0_i32_0 = arith.constant 0 : i32
    %c0_i32_1 = arith.constant 0 : i32
    return %arg0, %c0_i32, %c0_i32_0 : i32, i32, i32
  }
}

</mosaic_0001>

<bundles_post_ra>
// kernel: lenet_forward.1
= control target key start
LH: loop header
LB: loop body
LE: loop exit
PB: predicated region body
PF: predicated region fallthrough
CT: control target
= control target key end

     0   :  { %s5099_s0 = inlined_call_operand.vmem [shape: f32[2,32,32], index: 0, kind: input, shape index: {}]   ;;  %s5100_s1 = inlined_call_operand.vmem [shape: bf16[5,32,84], index: 1, kind: input, shape index: {}]   ;;  %s5101_s2 = inlined_call_operand.vmem [shape: bf16[5,32,84], index: 2, kind: input, shape index: {}]   ;;  %s5102_s3 = inlined_call_operand.vmem [shape: f32[1,84], index: 3, kind: input, shape index: {}]   ;;  %s5103_s4 = inlined_call_operand.vmem [shape: bf16[14,28], index: 4, kind: input, shape index: {}]   ;;  %s5104_s5 = inlined_call_operand.vmem [shape: bf16[14,28], index: 5, kind: input, shape index: {}]   ;;  %s5105_s6 = inlined_call_operand.vmem [shape: bf16[5,84,80], index: 6, kind: input, shape index: {}]   ;;  %s5106_s7 = inlined_call_operand.vmem [shape: bf16[5,84,80], index: 7, kind: input, shape index: {}]   ;;  %s5107_s8 = inlined_call_operand.vmem [shape: f32[1,80], index: 8, kind: input, shape index: {}]   ;;  %s5108_s9 = inlined_call_operand.vmem [shape: bf16[5,10], index: 9, kind: input, shape index: {}]   ;;  %s5109_s10 = inlined_call_operand.vmem [shape: bf16[5,10], index: 10, kind: input, shape index: {}]   ;;  %s5110_s11 = inlined_call_operand.vmem [shape: bf16[400,120], index: 11, kind: input, shape index: {}]   ;;  %s5111_s12 = inlined_call_operand.vmem [shape: f32[1,120], index: 12, kind: input, shape index: {}]   ;;  %s5112_s13 = inlined_call_operand.vmem [shape: bf16[120,84], index: 13, kind: input, shape index: {}]   ;;  %s5113_s14 = inlined_call_operand.vmem [shape: f32[1,84], index: 14, kind: input, shape index: {}]   ;;  %s5114_s15 = inlined_call_operand.vmem [shape: bf16[84,10], index: 15, kind: input, shape index: {}]   ;;  %s5115_s16 = inlined_call_operand.vmem [shape: f32[1,10], index: 16, kind: input, shape index: {}]   ;;  %s5116_s17 = inlined_call_operand.hbm [shape: f32[2,1,10], index: 17, kind: output, shape index: {}]  }
   0x1   :  { %5125 = sst [smem:[#allocation11_spill]] %s5099_s0 }
   0x2   :  { %5126 = sst [smem:[#allocation12_spill]] %s5100_s1 }
   0x3   :  { %5127 = sst [smem:[#allocation13_spill]] %s5116_s17 }
   0x4   :  { %22 = vsyncpa [#allocation3], 0 }
   0x5   :  { %24 = vsyncpa [#allocation3 + $0x1], 0  ;;  %s4385_s24 = smov 0   ;;  %s4387_s25 = smov 0  }
   0x6   :  { %s4389_s26 = smov 0   ;;  %s4391_s27 = smov 0  }
   0x7 LB: > { %5128 = sst [smem:[#allocation5_spill]] %s4278_s24  ;;  %s4406_s28 = sadd.s32 4294967295, %s4290_s27   ;;  %s4290_s27 = sphi %s4391_s27, %s5143_s27   ;;  %s4286_s26 = sphi %s4389_s26, %s5145_s26   ;;  %s4282_s25 = sphi %s4387_s25, %s5147_s25   ;;  %s4278_s24 = sphi %s4385_s24, %s5146_s24  }
   0x8   : > { %5129 = sst [smem:[#allocation6_spill]] %s4286_s26  ;;  %s3168_s29 = sadd.s32 4294967294, %s4290_s27  }
   0x9   : > { %5130 = sst [smem:[#allocation7_spill]] %s4290_s27  ;;  %s4410_s0 = sadd.s32 1, %s4290_s27  }
   0xa   : > { %5131 = sst [smem:[#allocation8_spill]] %s4410_s0  ;;  %s399_s30 = sadd.s32 1, %s4286_s26 }
   0xb   : > { %s396_s18 = ssub.s32 %s4290_s27, %s4410_s0  ;;  %p409_p0 = scmp.ne.s32.totalorder %s4286_s26, %s4282_s25 }
   0xc   : > { %p397_p1 = scmp.eq.s32.totalorder %s396_s18, 0  ;;  %p410_p2 = scmp.eq.s32.totalorder %s4406_s28, 1 }
   0xd   : > { %p415_p3 = scmp.ne.s32.totalorder %s4282_s25, %s4278_s24  ;;  %p416_p4 = scmp.eq.s32.totalorder %s3168_s29, 1 }
   0xe   : > { %s4421_s19 = scalar_select %p397_p1, %s4286_s26, %s399_s30  }
   0xf   : > { %p4423_p5 = por %p410_p2, %p409_p0  ;;  %p4427_p6 = por %p416_p4, %p415_p3 }
  0x10   : > { %5132 = sst [smem:[#allocation9_spill]] %s4421_s19  ;;  %p3171_p7 = scmp.ge.s32.totalorder %s4290_s27, 1 }
  0x11   : > { %s5134_s20 = scalar_select %p4427_p6, 1, 0 }
  0x12   : > { %p490_p8 = scmp.lt.s32.totalorder %s4290_s27, 3 }
  0x13   : > { %5135 = sst [smem:[#allocation10_spill]] %s5134_s20 }
  0x14   : > { %p491_p9 = pnand %p3171_p7, %p490_p8 }
  0x15   : > { %s5136_s23 = sld [smem:[#allocation12_spill]] (!%p491_p9)  ;;  %p541_p10 = scmp.lt.s32.totalorder (!%p491_p9), %s4406_s28, 1  ;;  %vm594_vm0 = vcmask (!%p491_p9), 261120   ;;  %vm566_vm1 = vsmask.f32 (!%p491_p9), 7424  ;;  %v4112_v10 = vld [vmem:[%s5101_s2 + $0x10] sm:$0xff] (!%p491_p9)  }
  0x16   : > { %494 = sbr.rel (%p491_p9) target bundleno = 1800 (0x708), region = 88  ;;  %s5137_s27 = sld [smem:[#allocation11_spill]] (!%p491_p9)  ;;  %vm849_vm2 = vcmask (!%p491_p9), 1046528   ;;  %v4114_v27 = vld [vmem:[%s5101_s2 + $0x18] sm:$0xff] (!%p491_p9)   ;;  %vm999_vm3 = vsmask.f32 (!%p491_p9), 6400 }
  0x17   : > { %v4116_v33 = vld [vmem:[%s5101_s2] sm:$0xff] (!%p491_p9)   ;;  %v4118_v35 = vld [vmem:[%s5101_s2 + $0x8] sm:$0xff] (!%p491_p9)   ;;  %vm1153_vm4 = vcmask (!%p491_p9), 1045504   ;;  %v4123_v44 = vld [vmem:[%s5101_s2 + $0x30] sm:$0xff] (!%p491_p9)   ;;  %v4292_v48 = vmov (!%p491_p9), 0.0   ;;  %vm4293_vm5 = vmmov (!%p491_p9), 0  }
  0x18   : > { %v4120_v40 = vld [vmem:[%s5101_s2 + $0x20] sm:$0xff] (!%p491_p9)   ;;  %v4122_v43 = vld [vmem:[%s5101_s2 + $0x28] sm:$0xff] (!%p491_p9)   ;;  %v4124_v45 = vld [vmem:[%s5101_s2 + $0x38] sm:$0xff] (!%p491_p9)   ;;  %vm1326_vm6 = vcmask (!%p491_p9), 228352   ;;  %vm1507_vm7 = vcmask (!%p491_p9), 1041408   ;;  %vm1503_vm8 = vcmask (!%p491_p9), 687104  }
  0x19   : > { %v4125_v46 = vld [vmem:[%s5101_s2 + $0x40] sm:$0xff] (!%p491_p9)   ;;  %v4126_v47 = vld [vmem:[%s5101_s2 + $0x48] sm:$0xff] (!%p491_p9)   ;;  %vm2377_vm9 = vcmask (!%p491_p9), 1044480   ;;  %vm2373_vm10 = vcmask (!%p491_p9), 80896   ;;  %vm2520_vm11 = vcmask (!%p491_p9), 654336   ;;  %vm2961_vm12 = vcmask (!%p491_p9), 1043456  }
  0x1a   : > { %v3246_v62 = vld [vmem:[%s5102_s3] ss:$0 sm:$0xff] (!%p491_p9)  ;;  %vm2957_vm13 = vcmask (!%p491_p9), 982016   ;;  %s3458_s18 = sshll.u32 (!%p491_p9), %s4406_s28, 4  ;;  %vm3098_vm14 = vcmask (!%p491_p9), 73728  }
  0x1b   : > { %v4107_v0 = vld [vmem:[%s5136_s23] sm:$0xff] (!%p491_p9)   ;;  %v4108_v1 = vld [vmem:[%s5136_s23 + $0x8] sm:$0xff] (!%p491_p9)   ;;  %v4109_v2 = vld [vmem:[%s5136_s23 + $0x10] sm:$0xff] (!%p491_p9)  }
  0x1c   : > { %3636 = vmatprep.subr.bf16.mxu0 (!%p491_p9), %v4107_v0  ;;  %v4110_v3 = vld [vmem:[%s5136_s23 + $0x18] sm:$0xff] (!%p491_p9)   ;;  %3628 = vmatprep.subr.bf16.mxu1 (!%p491_p9), %v4109_v2  ;;  %v4111_v4 = vld [vmem:[%s5136_s23 + $0x20] sm:$0xff] (!%p491_p9)   ;;  %v4113_v12 = vld [vmem:[%s5136_s23 + $0x28] sm:$0xff] (!%p491_p9)  }
  0x1d   : > { %s542_s26 = scalar_select %p541_p10, %s4406_s28, 1  ;;  %3637 = vmatpush3.bf16.msra.mxu0 %v4107_v0  ;;  %3629 = vmatpush3.bf16.msra.mxu1 %v4109_v2  ;;  %v4115_v24 = vld [vmem:[%s5136_s23 + $0x30] sm:$0xff]   ;;  %v4117_v34 = vld [vmem:[%s5136_s23 + $0x38] sm:$0xff]   ;;  %v4119_v37 = vld [vmem:[%s5136_s23 + $0x40] sm:$0xff]  }
  0x1e   : > { %3638 = vmatprep.subr.bf16.mxu0 %v4108_v1  ;;  %3630 = vmatprep.subr.bf16.mxu1 %v4110_v3  ;;  %v4121_v41 = vld [vmem:[%s5136_s23 + $0x48] sm:$0xff]  }
  0x1f   : > { %s3461_s21 = sshll.u32 %s542_s26, 5  ;;  %s5138_s26 = sld [smem:[#allocation13_spill]] }
  0x20   : > { %s545_s17 = scalar_lea.vmem %s5137_s27, %s3461_s21  ;;  %s4294_s27 = smov [#allocation2]  }
  0x21   : > { %v547_v5 = vld [vmem:[%s545_s17] sm:$0xff]  ;;  %v548_v6 = vld [vmem:[%s545_s17 + $0x8] sm:$0xff]  ;;  %v549_v7 = vld [vmem:[%s545_s17 + $0x10] sm:$0xff]  ;;  %3639 = vmatpush3.bf16.msra.mxu0 %v4108_v1  ;;  %3631 = vmatpush3.bf16.msra.mxu1 %v4110_v3  ;;  %s4232_s20 = sshll.u32 %s4294_s27, 4  ;;  %s4233_s20 = int_to_ptr.vmem [resolvable:$false] %s4232_s20 }
  0x22   : > { %v4453_v8 = vpack.c.bf16 %v548_v6, %v547_v5  ;;  %v550_v9 = vld [vmem:[%s545_s17 + $0x18] sm:$0xff]  ;;  %3660 = vmatprep.subr.bf16.mxu0 %v4111_v4  ;;  %3644 = vmatprep.subr.bf16.mxu1 %v4112_v10  ;;  %s539_s17 = sand.u32 1, %s4282_s25   ;;  %s4234_s29 = scalar_lea.vmem %s4233_s20, 32 }
  0x23   : > { %v4458_v11 = vpack.c.bf16 %v550_v9, %v549_v7  ;;  %s540_s21 = scalar_lea.vmem [#allocation2], %s539_s17  ;;  %s3101_s28 = scalar_lea.sflag [#allocation3], %s539_s17 }
  0x24   : > { %3640 = vmatprep.mubr.msk.bf16.mxu0 %vm594_vm0, %v4453_v8  ;;  %v568_v13 = vshrl.u32 %v4453_v8, 16  ;;  %v570_v14 = vshll.u32 %v4453_v8, 16  ;;  %v850_v15 = vrot.slane %v4453_v8, 1  ;;  %v1154_v38 = vrot.slane %v4453_v8, 2  ;;  %s3113_s22 = sshll.u32 %s540_s21, 4  ;;  %s5059_s22 = int_to_ptr.vmem [resolvable:$true] %s3113_s22 }
  0x25   : > { %3641 = vmatmul.mubr.msk.bf16.vlgmr.msra.gmra.mrb[0].mxu0 %vm594_vm0, %v4458_v11  ;;  %v575_v16 = vshll.u32 %v4458_v11, 16  ;;  %v579_v17 = vshrl.u32 %v4458_v11, 16  ;;  %v4473_v18 = vrot.slane %v4458_v11, 1  ;;  %v1155_v39 = vrot.slane %v4458_v11, 2  ;;  %s5139_s0 = smov %s5138_s26  ;;  %s5057_s24 = scalar_lea.hbm %s5138_s26, %s3458_s18 }
  0x26   : > { %v572_v19 = vrot.slane %v570_v14, 1  ;;  %3661 = vmatpush3.bf16.msra.mxu0 %v4111_v4  ;;  %v1000_v21 = vrot.slane %v568_v13, 1  ;;  %v1001_v28 = vrot.slane %v570_v14, 2  ;;  %s4228_s19 = scalar_lea.vmem %s5059_s22, 16  ;;  %p4235_p0 = scmp.lt.s32.totalorder %s5059_s22, %s4233_s20 }
  0x27   : > { %v577_v20 = vrot.slane %v575_v16, 1  ;;  %v1004_v22 = vrot.slane %v575_v16, 2  ;;  %3662 = vmatprep.subr.bf16.mxu0 %v4113_v12  ;;  %v852_v23 = vsel %vm849_vm2, %v850_v15, %v4473_v18  ;;  %v1003_v29 = vrot.slane %v579_v17, 1  ;;  %p4229_p11 = scmp.ne.s32.totalorder %s5059_s22, %s4228_s19  ;;  %p4236_p1 = scmp.lt.s32.totalorder %s4234_s29, %s4228_s19 }
  0x28   : > { %v573_v25 = vor.u32 %v572_v19, %v568_v13  ;;  %3664 = vmatprep.mubr.msk.bf16.mxu0 %vm594_vm0, %v852_v23  ;;  %v1002_v31 = vor.u32 %v1001_v28, %v1000_v21  ;;  %v1156_v42 = vsel %vm1153_vm4, %v1154_v38, %v1155_v39  ;;  %v4129_v19 = vld [vmem:[%s5105_s6 + $0x2c] sm:$0xff]   ;;  %v4131_v21 = vld [vmem:[%s5105_s6 + $0x34] sm:$0xff]  }
  0x29   : > { %v581_v26 = vor.u32 %v579_v17, %v577_v20  ;;  %v1005_v32 = vor.u32 %v1004_v22, %v1003_v29  ;;  %v4127_v17 = vld [vmem:[%s5103_s4] sm:$0x7f]   ;;  %v4132_v22 = vld [vmem:[%s5106_s7 + $0x34] sm:$0xff]   ;;  %v4138_v28 = vld [vmem:[%s5106_s7 + $0x4c] sm:$0xff]   ;;  %p4230_p12 = pnand %p4229_p11, %p4423_p5  ;;  %p4237_p2 = por %p4236_p1, %p4235_p0 }
  0x2a   : > { %v578_v30 = vsel %vm566_vm1, %v573_v25, %v577_v20  ;;  %3663 = vmatpush3.bf16.msra.mxu0 %v4113_v12  ;;  %v4130_v20 = vld [vmem:[%s5106_s7 + $0x2c] sm:$0xff]   ;;  %v4135_v25 = vld [vmem:[%s5105_s6 + $0x44] sm:$0xff]   ;;  %v4139_v29 = vld [vmem:[%s5105_s6 + $0x54] ss:$0 sps:$4 sm:$0x33]  }
  0x2b   : > { %3632 = vmatprep.mubr.msk.bf16.mxu1 %vm594_vm0, %v578_v30  ;;  %3676 = vmatprep.subr.bf16.mxu0 %v4115_v24  ;;  %v1006_v36 = vsel %vm999_vm3, %v1002_v31, %v1005_v32  ;;  %v1509_v31 = vsel %vm1507_vm7, %v4139_v29, 0  ;;  %p4231_p13 = pneg %p4230_p12 }
  0x2c   : > { %3633 = vmatmul.mubr.msk.bf16.vlgmr.msra.gmra.mrb[0].mxu1 %vm594_vm0, %v581_v26 }
  0x2d   : > { %3645 = vmatpush3.bf16.msra.mxu1 %v4112_v10  ;;  %3648 = vmatprep.mubr.msk.bf16.mxu1 %vm594_vm0, %v578_v30  ;;  %v4140_v30 = vld [vmem:[%s5106_s7 + $0x54] ss:$0 sps:$4 sm:$0x33]   ;;  %p4238_p3 = pnand %p4237_p2, %p4231_p13 }
  0x2e   : > { %3646 = vmatprep.subr.bf16.mxu1 %v4114_v27 }
  0x31   : > { %3647 = vmatpush3.bf16.msra.mxu1 %v4114_v27  ;;  %3665 = vmatmul.mubr.msk.bf16.vlgmr.msra.gmra.mrb[0].mxu0 %vm594_vm0, %v4473_v18  ;;  %v4137_v27 = vld [vmem:[%s5105_s6 + $0x4c] sm:$0xff]  }
  0x32   : > { %3677 = vmatpush3.bf16.msra.mxu0 %v4115_v24  ;;  %3652 = vmatprep.subr.bf16.mxu1 %v4116_v33  ;;  %v4134_v24 = vld [vmem:[%s5106_s7 + $0x3c] sm:$0xff]  }
  0x33   : > { %3678 = vmatprep.subr.bf16.mxu0 %v4117_v34  ;;  %3680 = vmatprep.mubr.msk.bf16.mxu0 %vm594_vm0, %v1006_v36 }
  0x34   : > { %3649 = vmatmul.mubr.msk.bf16.vlgmr.msra.gmra.mrb[4].mxu1 %vm594_vm0, %v581_v26  ;;  %v4136_v26 = vld [vmem:[%s5106_s7 + $0x44] sm:$0xff]  }
  0x35   : > { %3653 = vmatpush3.bf16.msra.mxu1 %v4116_v33  ;;  %3656 = vmatprep.mubr.msk.bf16.mxu1 %vm594_vm0, %v4453_v8 }
  0x36   : > { %3679 = vmatpush3.bf16.msra.mxu0 %v4117_v34  ;;  %3654 = vmatprep.subr.bf16.mxu1 %v4118_v35 }
  0x37   : > { %3692 = vmatprep.subr.bf16.mxu0 %v4119_v37 }
  0x39   : > { %3655 = vmatpush3.bf16.msra.mxu1 %v4118_v35 }
  0x3a   : > { %3668 = vmatprep.subr.bf16.mxu1 %v4120_v40 }
  0x3d   : > { %3681 = vmatmul.mubr.msk.bf16.vlgmr.msra.gmra.mrb[0].mxu0 %vm594_vm0, %v1005_v32 }
  0x3e   : > { %3693 = vmatpush3.bf16.msra.mxu0 %v4119_v37  ;;  %3696 = vmatprep.mubr.msk.bf16.mxu0 %vm594_vm0, %v1156_v42 }
  0x3f   : > { %3694 = vmatprep.subr.bf16.mxu0 %v4121_v41 }
  0x40   : > { %3657 = vmatmul.mubr.msk.bf16.vlgmr.msra.gmra.mrb[4].mxu1 %vm594_vm0, %v4458_v11 }
  0x41   : > { %3669 = vmatpush3.bf16.msra.mxu1 %v4120_v40  ;;  %3672 = vmatprep.mubr.msk.bf16.mxu1 %vm594_vm0, %v852_v23  ;;  %v4133_v23 = vld [vmem:[%s5105_s6 + $0x3c] sm:$0xff]  }
  0x42   : > { %3695 = vmatpush3.bf16.msra.mxu0 %v4121_v41  ;;  %3670 = vmatprep.subr.bf16.mxu1 %v4122_v43 }
  0x43   : > { %3708 = vmatprep.subr.bf16.mxu0 %v4292_v48 }
  0x45   : > { %3671 = vmatpush3.bf16.msra.mxu1 %v4122_v43 }
  0x46   : > { %3684 = vmatprep.subr.bf16.mxu1 %v4123_v44 }
  0x49   : > { %3697 = vmatmul.mubr.msk.bf16.vlgmr.msra.gmra.mrb[0].mxu0 %vm594_vm0, %v1155_v39 }
  0x4a   : > { %3712 = vmatprep.mubr.msk.bf16.mxu0 %vm4293_vm5, %v4292_v48 }
  0x4c   : > { %3673 = vmatmul.mubr.msk.bf16.vlgmr.msra.gmra.mrb[4].mxu1 %vm594_vm0, %v4473_v18  ;;  %v4128_v18 = vld [vmem:[%s5104_s5] sm:$0x7f]  }
  0x4d   : > { %3685 = vmatpush3.bf16.msra.mxu1 %v4123_v44  ;;  %3688 = vmatprep.mubr.msk.bf16.mxu1 %vm594_vm0, %v1006_v36 }
  0x4e   : > { %3686 = vmatprep.subr.bf16.mxu1 %v4124_v45 }
  0x51   : > { %3687 = vmatpush3.bf16.msra.mxu1 %v4124_v45 }
  0x52   : > { %3700 = vmatprep.subr.bf16.mxu1 %v4125_v46 }
  0x58   : > { %3689 = vmatmul.mubr.msk.bf16.vlgmr.msra.gmra.mrb[4].mxu1 %vm594_vm0, %v1005_v32  ;;  %v1677_v32 = vsel %vm1507_vm7, %v4140_v30, 0 }
  0x59   : > { %3701 = vmatpush3.bf16.msra.mxu1 %v4125_v46  ;;  %3704 = vmatprep.mubr.msk.bf16.mxu1 %vm594_vm0, %v1156_v42 }
  0x5a   : > { %3702 = vmatprep.subr.bf16.mxu1 %v4126_v47 }
  0x5d   : > { %3703 = vmatpush3.bf16.msra.mxu1 %v4126_v47 }
  0x5e   : > { %3716 = vmatprep.subr.bf16.mxu1 %v4292_v48 }
  0x64   : > { %3705 = vmatmul.mubr.msk.bf16.vlgmr.msra.gmra.mrb[4].mxu1 %vm594_vm0, %v1155_v39 }
  0x65   : > { %3720 = vmatprep.mubr.msk.bf16.mxu1 %vm4293_vm5, %v4292_v48 }
  0xff   : > { %v3634_v49 = vpop.f32.mrb[0].mxu1 }
 0x100   : > { %v635_v50 = vpop.f32.mrb[1].mxu1 }
 0x101   : > { %v3635_v51 = vpop.f32.mrb[2].mxu1 }
 0x102   : > { %v638_v52 = vpop.f32.mrb[3].mxu1 }
 0x11c   : > { %v3698_v53 = vpop.f32.mrb[0].mxu0 }
 0x11d   : > { %v4002_v54 = vadd.f32 %v3698_v53, %v3634_v49  ;;  %v1209_v55 = vpop.f32.mrb[1].mxu0 }
 0x11e   : > { %v4003_v56 = vadd.f32 %v1209_v55, %v635_v50  ;;  %v3699_v57 = vpop.f32.mrb[2].mxu0  ;;  %v4141_v50 = vld [vmem:[%s5105_s6] sm:$0xff]   ;;  %v4144_v55 = vld [vmem:[%s5106_s7 + $0x8] sm:$0xff]  }
 0x11f   : > { %v4004_v58 = vadd.f32 %v3699_v57, %v3635_v51  ;;  %v1212_v59 = vpop.f32.mrb[3].mxu0  ;;  %v4142_v51 = vld [vmem:[%s5106_s7] sm:$0xff]   ;;  %v4146_v57 = vld [vmem:[%s5106_s7 + $0x10] sm:$0xff]  }
 0x120   : > { %v4005_v60 = vadd.f32 %v1212_v59, %v638_v52  ;;  %v4148_v59 = vld [vmem:[%s5106_s7 + $0x18] sm:$0xff]  }
 0x137   : > { %v3706_v61 = vpop.f32.mrb[4].mxu1 }
 0x138   : > { %v1300_v63 = vmax.f32 %v4002_v54, %v3706_v61  ;;  %v1279_v0 = vpop.f32.mrb[5].mxu1  ;;  %v4143_v54 = vld [vmem:[%s5105_s6 + $0x8] sm:$0xff]   ;;  %v4150_v61 = vld [vmem:[%s5106_s7 + $0x20] sm:$0xff]  }
 0x139   : > { %v1298_v1 = vmax.f32 %v4003_v56, %v1279_v0  ;;  %v3707_v2 = vpop.f32.mrb[6].mxu1  ;;  %v4145_v56 = vld [vmem:[%s5105_s6 + $0x10] sm:$0xff]  }
 0x13a   : > { %v1311_v3 = vadd.f32 %v3246_v62, %v1300_v63  ;;  %v1301_v4 = vmax.f32 %v4004_v58, %v3707_v2  ;;  %v1282_v5 = vpop.f32.mrb[7].mxu1  ;;  %v4147_v58 = vld [vmem:[%s5105_s6 + $0x18] sm:$0xff]   ;;  %v4152_v63 = vld [vmem:[%s5106_s7 + $0x28] ss:$0 sps:$4 sm:$0x33]  }
 0x13b   : > { %v1309_v6 = vadd.f32 %v3246_v62, %v1298_v1  ;;  %v1299_v7 = vmax.f32 %v4005_v60, %v1282_v5  ;;  %v4149_v60 = vld [vmem:[%s5105_s6 + $0x20] sm:$0xff]   ;;  %v1754_v1 = vsel %vm1507_vm7, %v4152_v63, 0  ;;  %v4153_v2 = vld [vmem:[%s5105_s6 + $0x58] sm:$0xff]  }
 0x13c   : > { %v1312_v8 = vadd.f32 %v3246_v62, %v1301_v4  ;;  %v1315_v10 = vmax.f32 %v1311_v3, 0.0  ;;  %v4154_v3 = vld [vmem:[%s5106_s7 + $0x58] sm:$0xff]   ;;  %v4155_v4 = vld [vmem:[%s5105_s6 + $0x60] sm:$0xff]  }
 0x13d   : > { %v1310_v9 = vadd.f32 %v3246_v62, %v1299_v7  ;;  %v1313_v12 = vmax.f32 %v1309_v6, 0.0  ;;  %v4151_v62 = vld [vmem:[%s5105_s6 + $0x28] ss:$0 sps:$4 sm:$0x33]   ;;  %v4156_v5 = vld [vmem:[%s5106_s7 + $0x60] sm:$0xff]  }
 0x13e   : > { %v1316_v11 = vmax.f32 %v1312_v8, 0.0  ;;  %v1588_v0 = vsel %vm1507_vm7, %v4151_v62, 0  ;;  %v4157_v6 = vld [vmem:[%s5105_s6 + $0x68] sm:$0xff]   ;;  %v4159_v8 = vld [vmem:[%s5105_s6 + $0x70] sm:$0xff]  }
 0x13f   : > { %v1314_v13 = vmax.f32 %v1310_v9, 0.0  ;;  %v4158_v7 = vld [vmem:[%s5106_s7 + $0x68] sm:$0xff]   ;;  %v4160_v9 = vld [vmem:[%s5106_s7 + $0x70] sm:$0xff]  }
 0x140   : > { %v1318_v14 = vpack.c.bf16 %v1316_v11, %v1315_v10  ;;  %v4161_v10 = vld [vmem:[%s5105_s6 + $0x78] sm:$0xff]  }
 0x141   : > { %v1317_v15 = vpack.c.bf16 %v1314_v13, %v1313_v12  ;;  %v4162_v11 = vld [vmem:[%s5106_s7 + $0x78] sm:$0xff]   ;;  %v4163_v12 = vld [vmem:[%s5105_s6 + $0x80] ss:$0 sps:$4 sm:$0x33]  }
 0x142   : > { %v1332_v16 = vsel %vm1153_vm4, %v1318_v14, 0  ;;  %v4164_v13 = vld [vmem:[%s5106_s7 + $0x80] ss:$0 sps:$4 sm:$0x33]   ;;  %v1848_v14 = vsel %vm1507_vm7, %v4163_v12, 0 }
 0x143   : > { %3709 = vmatpush3.bf16.msra.mxu0 %v1317_v15  ;;  %3717 = vmatpush3.bf16.msra.mxu1 %v1317_v15  ;;  %v1939_v15 = vsel %vm1507_vm7, %v4164_v13, 0 }
 0x144   : > { %3710 = vmatprep.subr.bf16.mxu0 %v4292_v48  ;;  %3718 = vmatprep.subr.bf16.mxu1 %v4292_v48 }
 0x147   : > { %3711 = vmatpush3.bf16.msra.mxu0 %v1332_v16  ;;  %3719 = vmatpush3.bf16.msra.mxu1 %v1332_v16  ;;  %v4165_v16 = vld [vmem:[%s5105_s6 + $0x84] sm:$0xff]  }
 0x148   : > { %3724 = vmatprep.subr.bf16.mxu0 %v4292_v48  ;;  %3756 = vmatprep.subr.bf16.mxu1 %v4292_v48 }
 0x14a   : > { %3713 = vmatmul.mubr.msk.bf16.vlgmr.msra.gmra.mrb[4].mxu0 %vm1326_vm6, %v4127_v17  ;;  %3721 = vmatmul.mubr.msk.bf16.vlgmr.msra.gmra.mrb[8].mxu1 %vm1326_vm6, %v4128_v18  ;;  %v4166_v17 = vld [vmem:[%s5106_s7 + $0x84] sm:$0xff]  }
 0x14b   : > { %3725 = vmatpush3.bf16.msra.mxu0 %v4129_v19  ;;  %3757 = vmatpush3.bf16.msra.mxu1 %v4130_v20  ;;  %v4167_v19 = vld [vmem:[%s5105_s6 + $0x8c] sm:$0xff]  }
 0x14c   : > { %3726 = vmatprep.subr.bf16.mxu0 %v4292_v48  ;;  %3758 = vmatprep.subr.bf16.mxu1 %v4292_v48  ;;  %v4168_v20 = vld [vmem:[%s5106_s7 + $0x8c] sm:$0xff]  }
 0x14d   : > { %3736 = vmatprep.mubr.msk.bf16.mxu0 %vm4293_vm5, %v4292_v48  ;;  %3768 = vmatprep.mubr.msk.bf16.mxu1 %vm4293_vm5, %v4292_v48 }
 0x14f   : > { %3727 = vmatpush3.bf16.msra.mxu0 %v4131_v21  ;;  %3759 = vmatpush3.bf16.msra.mxu1 %v4132_v22  ;;  %v4169_v21 = vld [vmem:[%s5105_s6 + $0x94] sm:$0xff]  }
 0x150   : > { %3728 = vmatprep.subr.bf16.mxu0 %v4292_v48  ;;  %3760 = vmatprep.subr.bf16.mxu1 %v4292_v48  ;;  %v4170_v22 = vld [vmem:[%s5106_s7 + $0x94] sm:$0xff]  }
 0x153   : > { %3729 = vmatpush3.bf16.msra.mxu0 %v4133_v23  ;;  %3761 = vmatpush3.bf16.msra.mxu1 %v4134_v24  ;;  %v4171_v23 = vld [vmem:[%s5105_s6 + $0x9c] sm:$0xff]  }
 0x154   : > { %3730 = vmatprep.subr.bf16.mxu0 %v4292_v48  ;;  %3762 = vmatprep.subr.bf16.mxu1 %v4292_v48  ;;  %v4172_v24 = vld [vmem:[%s5106_s7 + $0x9c] sm:$0xff]  }
 0x157   : > { %3731 = vmatpush3.bf16.msra.mxu0 %v4135_v25  ;;  %3763 = vmatpush3.bf16.msra.mxu1 %v4136_v26  ;;  %v4173_v25 = vld [vmem:[%s5105_s6 + $0xa4] sm:$0xff]  }
 0x158   : > { %3732 = vmatprep.subr.bf16.mxu0 %v4292_v48  ;;  %3764 = vmatprep.subr.bf16.mxu1 %v4292_v48  ;;  %v4174_v26 = vld [vmem:[%s5106_s7 + $0xa4] sm:$0xff]  }
 0x15b   : > { %3733 = vmatpush3.bf16.msra.mxu0 %v4137_v27  ;;  %3765 = vmatpush3.bf16.msra.mxu1 %v4138_v28  ;;  %v4175_v27 = vld [vmem:[%s5105_s6 + $0xac] ss:$0 sps:$4 sm:$0x33]  }
 0x15c   : > { %3734 = vmatprep.subr.bf16.mxu0 %v4292_v48  ;;  %3766 = vmatprep.subr.bf16.mxu1 %v4292_v48  ;;  %v4176_v28 = vld [vmem:[%s5106_s7 + $0xac] ss:$0 sps:$4 sm:$0x33]   ;;  %v2036_v29 = vsel %vm1507_vm7, %v4175_v27, 0 }
 0x15d   : > { %v2127_v30 = vsel %vm1507_vm7, %v4176_v28, 0  ;;  %v4203_v27 = vld [vmem:[%s5110_s11 + $0x88] sm:$0xff]   ;;  %v4204_v28 = vld [vmem:[%s5110_s11 + $0x60] sm:$0xff]  }
 0x15f   : > { %3735 = vmatpush3.bf16.msra.mxu0 %v1509_v31  ;;  %3767 = vmatpush3.bf16.msra.mxu1 %v1677_v32  ;;  %v4177_v31 = vld [vmem:[%s5105_s6 + $0xb0] sm:$0xff]  }
 0x160   : > { %3740 = vmatprep.subr.bf16.mxu0 %v4292_v48  ;;  %3772 = vmatprep.subr.bf16.mxu1 %v4292_v48  ;;  %v4178_v32 = vld [vmem:[%s5106_s7 + $0xb0] sm:$0xff]  }
 0x21d   : > { %v1368_v33 = vpop.f32.mrb[4].mxu0  ;;  %v1419_v34 = vpop.f32.mrb[8].mxu1 }
 0x21e   : > { %v1426_v35 = vmax.f32 %v1368_v33, %v1419_v34  ;;  %v3714_v36 = vpop.f32.mrb[5].mxu0  ;;  %v3722_v37 = vpop.f32.mrb[9].mxu1  ;;  %v4179_v33 = vld [vmem:[%s5105_s6 + $0xb8] sm:$0xff]  }
 0x21f   : > { %v1371_v38 = vpop.f32.mrb[6].mxu0  ;;  %v1422_v39 = vpop.f32.mrb[10].mxu1  ;;  %v4180_v34 = vld [vmem:[%s5106_s7 + $0xb8] sm:$0xff]   ;;  %v4182_v36 = vld [vmem:[%s5106_s7 + $0xc0] sm:$0xff]   ;;  %v4183_v37 = vld [vmem:[%s5105_s6 + $0xc8] sm:$0xff]  }
 0x220   : > { %v1427_v40 = vmax.f32 %v1371_v38, %v1422_v39  ;;  %v3715_v41 = vpop.f32.mrb[7].mxu0  ;;  %v3723_v42 = vpop.f32.mrb[11].mxu1  ;;  %v4184_v38 = vld [vmem:[%s5106_s7 + $0xc8] sm:$0xff]   ;;  %v4185_v39 = vld [vmem:[%s5105_s6 + $0xd0] sm:$0xff]  }
 0x221   : > { %v4187_v41 = vld [vmem:[%s5105_s6 + $0xd8] ss:$0 sps:$4 sm:$0x33]  }
 0x222   : > { %v4615_v43 = vpack.c.bf16 %v1427_v40, %v1426_v35  ;;  %v4181_v35 = vld [vmem:[%s5105_s6 + $0xc0] sm:$0xff]   ;;  %v4186_v40 = vld [vmem:[%s5106_s7 + $0xd0] sm:$0xff]   ;;  %v4188_v42 = vld [vmem:[%s5106_s7 + $0xd8] ss:$0 sps:$4 sm:$0x33]  }
 0x224   : > { %v1464_v44 = vshrl.u32 %v4615_v43, 16  ;;  %v1466_v45 = vshll.u32 %v4615_v43, 16  ;;  %v1810_v18 = vrot.slane %v4615_v43, 1 }
 0x226   : > { %v1468_v46 = vrot.slane %v1466_v45, 1  ;;  %v1996_v47 = vrot.slane %v1464_v44, 1  ;;  %v1997_v49 = vrot.slane %v1466_v45, 2  ;;  %v2313_v45 = vsel %vm1507_vm7, %v4188_v42, 0  ;;  %v4215_v42 = vld [vmem:[%s5112_s13 + $0x8] sm:$0xff]  }
 0x228   : > { %v1469_v52 = vor.u32 %v1468_v46, %v1464_v44  ;;  %v4625_v53 = vor.u32 %v1997_v49, %v1996_v47  ;;  %v2222_v44 = vsel %vm1507_vm7, %v4187_v41, 0  ;;  %v2184_v46 = vrot.slane %v4615_v43, 2  ;;  %v4214_v41 = vld [vmem:[%s5112_s13] sm:$0xff]  }
 0x22a   : > { %3737 = vmatmul.mubr.msk.bf16.vlgmr.msra.gmra.mrb[8].mxu0 %vm1503_vm8, %v1469_v52  ;;  %3769 = vmatmul.mubr.msk.bf16.vlgmr.msra.gmra.mrb[12].mxu1 %vm1503_vm8, %v1469_v52 }
 0x22b   : > { %3741 = vmatpush3.bf16.msra.mxu0 %v4141_v50  ;;  %3773 = vmatpush3.bf16.msra.mxu1 %v4142_v51 }
 0x22c   : > { %3742 = vmatprep.subr.bf16.mxu0 %v4292_v48  ;;  %3774 = vmatprep.subr.bf16.mxu1 %v4292_v48 }
 0x22d   : > { %3752 = vmatprep.mubr.msk.bf16.mxu0 %vm4293_vm5, %v4292_v48  ;;  %3784 = vmatprep.mubr.msk.bf16.mxu1 %vm4293_vm5, %v4292_v48 }
 0x22f   : > { %3743 = vmatpush3.bf16.msra.mxu0 %v4143_v54  ;;  %3775 = vmatpush3.bf16.msra.mxu1 %v4144_v55 }
 0x230   : > { %3744 = vmatprep.subr.bf16.mxu0 %v4292_v48  ;;  %3776 = vmatprep.subr.bf16.mxu1 %v4292_v48 }
 0x233   : > { %3745 = vmatpush3.bf16.msra.mxu0 %v4145_v56  ;;  %3777 = vmatpush3.bf16.msra.mxu1 %v4146_v57 }
 0x234   : > { %3746 = vmatprep.subr.bf16.mxu0 %v4292_v48  ;;  %3778 = vmatprep.subr.bf16.mxu1 %v4292_v48 }
 0x237   : > { %3747 = vmatpush3.bf16.msra.mxu0 %v4147_v58  ;;  %3779 = vmatpush3.bf16.msra.mxu1 %v4148_v59 }
 0x238   : > { %3748 = vmatprep.subr.bf16.mxu0 %v4292_v48  ;;  %3780 = vmatprep.subr.bf16.mxu1 %v4292_v48 }
 0x23b   : > { %3749 = vmatpush3.bf16.msra.mxu0 %v4149_v60  ;;  %3781 = vmatpush3.bf16.msra.mxu1 %v4150_v61 }
 0x23c   : > { %3750 = vmatprep.subr.bf16.mxu0 %v4292_v48  ;;  %3782 = vmatprep.subr.bf16.mxu1 %v4292_v48 }
 0x23f   : > { %3751 = vmatpush3.bf16.msra.mxu0 %v1588_v0  ;;  %3783 = vmatpush3.bf16.msra.mxu1 %v1754_v1  ;;  %v2372_v0 = vld [vmem:[%s5108_s9] sm:$0x7] }
 0x240   : > { %3788 = vmatprep.subr.bf16.mxu0 %v4292_v48  ;;  %3804 = vmatprep.subr.bf16.mxu1 %v4292_v48  ;;  %v2421_v1 = vld [vmem:[%s5109_s10] sm:$0x7] }
 0x242   : > { %3753 = vmatmul.mubr.msk.bf16.vlgmr.msra.gmra.mrb[8].mxu0 %vm1503_vm8, %v4615_v43  ;;  %3785 = vmatmul.mubr.msk.bf16.vlgmr.msra.gmra.mrb[12].mxu1 %vm1503_vm8, %v4615_v43  ;;  %v3409_v43 = vld [vmem:[%s5107_s8] ss:$0 sm:$0xff] }
 0x243   : > { %3789 = vmatpush3.bf16.msra.mxu0 %v4153_v2  ;;  %3805 = vmatpush3.bf16.msra.mxu1 %v4154_v3  ;;  %v4189_v2 = vld [vmem:[%s5110_s11] sm:$0xff]   ;;  %v4190_v3 = vld [vmem:[%s5110_s11 + $0x28] sm:$0xff]  }
 0x244   : > { %3790 = vmatprep.subr.bf16.mxu0 %v4292_v48  ;;  %3806 = vmatprep.subr.bf16.mxu1 %v4292_v48 }
 0x245   : > { %3800 = vmatprep.mubr.msk.bf16.mxu0 %vm4293_vm5, %v4292_v48  ;;  %3816 = vmatprep.mubr.msk.bf16.mxu1 %vm4293_vm5, %v4292_v48 }
 0x247   : > { %3791 = vmatpush3.bf16.msra.mxu0 %v4155_v4  ;;  %3807 = vmatpush3.bf16.msra.mxu1 %v4156_v5  ;;  %v4191_v4 = vld [vmem:[%s5110_s11 + $0x8] sm:$0xff]   ;;  %v4192_v5 = vld [vmem:[%s5110_s11 + $0x30] sm:$0xff]  }
 0x248   : > { %3792 = vmatprep.subr.bf16.mxu0 %v4292_v48  ;;  %3808 = vmatprep.subr.bf16.mxu1 %v4292_v48 }
 0x24b   : > { %3793 = vmatpush3.bf16.msra.mxu0 %v4157_v6  ;;  %3809 = vmatpush3.bf16.msra.mxu1 %v4158_v7  ;;  %v4193_v6 = vld [vmem:[%s5110_s11 + $0x10] sm:$0xff]   ;;  %v4194_v7 = vld [vmem:[%s5110_s11 + $0x38] sm:$0xff]  }
 0x24c   : > { %3794 = vmatprep.subr.bf16.mxu0 %v4292_v48  ;;  %3810 = vmatprep.subr.bf16.mxu1 %v4292_v48 }
 0x24f   : > { %3795 = vmatpush3.bf16.msra.mxu0 %v4159_v8  ;;  %3811 = vmatpush3.bf16.msra.mxu1 %v4160_v9  ;;  %v4195_v8 = vld [vmem:[%s5110_s11 + $0x18] sm:$0xff]   ;;  %v4196_v9 = vld [vmem:[%s5110_s11 + $0x40] sm:$0xff]  }
 0x250   : > { %3796 = vmatprep.subr.bf16.mxu0 %v4292_v48  ;;  %3812 = vmatprep.subr.bf16.mxu1 %v4292_v48 }
 0x253   : > { %3797 = vmatpush3.bf16.msra.mxu0 %v4161_v10  ;;  %3813 = vmatpush3.bf16.msra.mxu1 %v4162_v11  ;;  %v4197_v10 = vld [vmem:[%s5110_s11 + $0x20] sm:$0xff]   ;;  %v4198_v11 = vld [vmem:[%s5110_s11 + $0x48] sm:$0xff]  }
 0x254   : > { %3798 = vmatprep.subr.bf16.mxu0 %v4292_v48  ;;  %3814 = vmatprep.subr.bf16.mxu1 %v4292_v48 }
 0x257   : > { %3799 = vmatpush3.bf16.msra.mxu0 %v1848_v14  ;;  %3815 = vmatpush3.bf16.msra.mxu1 %v1939_v15 }
 0x258   : > { %3820 = vmatprep.subr.bf16.mxu0 %v4292_v48  ;;  %3836 = vmatprep.subr.bf16.mxu1 %v4292_v48 }
 0x25a   : > { %3801 = vmatmul.mubr.msk.bf16.vlgmr.msra.gmra.mrb[8].mxu0 %vm1503_vm8, %v1810_v18  ;;  %3817 = vmatmul.mubr.msk.bf16.vlgmr.msra.gmra.mrb[12].mxu1 %vm1503_vm8, %v1810_v18 }
 0x25b   : > { %3821 = vmatpush3.bf16.msra.mxu0 %v4165_v16  ;;  %3837 = vmatpush3.bf16.msra.mxu1 %v4166_v17 }
 0x25c   : > { %3822 = vmatprep.subr.bf16.mxu0 %v4292_v48  ;;  %3838 = vmatprep.subr.bf16.mxu1 %v4292_v48 }
 0x25d   : > { %3832 = vmatprep.mubr.msk.bf16.mxu0 %vm4293_vm5, %v4292_v48  ;;  %3848 = vmatprep.mubr.msk.bf16.mxu1 %vm4293_vm5, %v4292_v48 }
 0x25f   : > { %3823 = vmatpush3.bf16.msra.mxu0 %v4167_v19  ;;  %3839 = vmatpush3.bf16.msra.mxu1 %v4168_v20  ;;  %v4199_v19 = vld [vmem:[%s5110_s11 + $0x78] sm:$0xff]  }
 0x260   : > { %3824 = vmatprep.subr.bf16.mxu0 %v4292_v48  ;;  %3840 = vmatprep.subr.bf16.mxu1 %v4292_v48 }
 0x263   : > { %3825 = vmatpush3.bf16.msra.mxu0 %v4169_v21  ;;  %3841 = vmatpush3.bf16.msra.mxu1 %v4170_v22 }
 0x264   : > { %3826 = vmatprep.subr.bf16.mxu0 %v4292_v48  ;;  %3842 = vmatprep.subr.bf16.mxu1 %v4292_v48 }
 0x267   : > { %3827 = vmatpush3.bf16.msra.mxu0 %v4171_v23  ;;  %3843 = vmatpush3.bf16.msra.mxu1 %v4172_v24  ;;  %v4200_v23 = vld [vmem:[%s5110_s11 + $0x50] sm:$0xff]  }
 0x268   : > { %3828 = vmatprep.subr.bf16.mxu0 %v4292_v48  ;;  %3844 = vmatprep.subr.bf16.mxu1 %v4292_v48 }
 0x26b   : > { %3829 = vmatpush3.bf16.msra.mxu0 %v4173_v25  ;;  %3845 = vmatpush3.bf16.msra.mxu1 %v4174_v26  ;;  %v4201_v25 = vld [vmem:[%s5110_s11 + $0x80] sm:$0xff]   ;;  %v4202_v26 = vld [vmem:[%s5110_s11 + $0x58] sm:$0xff]  }
 0x26c   : > { %3830 = vmatprep.subr.bf16.mxu0 %v4292_v48  ;;  %3846 = vmatprep.subr.bf16.mxu1 %v4292_v48 }
 0x26f   : > { %3831 = vmatpush3.bf16.msra.mxu0 %v2036_v29  ;;  %3847 = vmatpush3.bf16.msra.mxu1 %v2127_v30  ;;  %v4205_v29 = vld [vmem:[%s5110_s11 + $0x90] sm:$0xff]   ;;  %v4206_v30 = vld [vmem:[%s5110_s11 + $0x68] sm:$0xff]  }
 0x270   : > { %3852 = vmatprep.subr.bf16.mxu0 %v4292_v48  ;;  %3868 = vmatprep.subr.bf16.mxu1 %v4292_v48 }
 0x272   : > { %3833 = vmatmul.mubr.msk.bf16.vlgmr.msra.gmra.mrb[8].mxu0 %vm1503_vm8, %v4625_v53  ;;  %3849 = vmatmul.mubr.msk.bf16.vlgmr.msra.gmra.mrb[12].mxu1 %vm1503_vm8, %v4625_v53 }
 0x273   : > { %3853 = vmatpush3.bf16.msra.mxu0 %v4177_v31  ;;  %3869 = vmatpush3.bf16.msra.mxu1 %v4178_v32  ;;  %v4207_v31 = vld [vmem:[%s5110_s11 + $0x98] sm:$0xff]   ;;  %v4208_v32 = vld [vmem:[%s5110_s11 + $0x70] sm:$0xff]  }
 0x274   : > { %3854 = vmatprep.subr.bf16.mxu0 %v4292_v48  ;;  %3870 = vmatprep.subr.bf16.mxu1 %v4292_v48 }
 0x275   : > { %3864 = vmatprep.mubr.msk.bf16.mxu0 %vm4293_vm5, %v4292_v48  ;;  %3880 = vmatprep.mubr.msk.bf16.mxu1 %vm4293_vm5, %v4292_v48 }
 0x277   : > { %3855 = vmatpush3.bf16.msra.mxu0 %v4179_v33  ;;  %3871 = vmatpush3.bf16.msra.mxu1 %v4180_v34  ;;  %v4209_v34 = vld [vmem:[%s5110_s11 + $0xa0] sm:$0xff]  }
 0x278   : > { %3856 = vmatprep.subr.bf16.mxu0 %v4292_v48  ;;  %3872 = vmatprep.subr.bf16.mxu1 %v4292_v48 }
 0x27b   : > { %3857 = vmatpush3.bf16.msra.mxu0 %v4181_v35  ;;  %3873 = vmatpush3.bf16.msra.mxu1 %v4182_v36  ;;  %v4210_v36 = vld [vmem:[%s5110_s11 + $0xa8] sm:$0xff]  }
 0x27c   : > { %3858 = vmatprep.subr.bf16.mxu0 %v4292_v48  ;;  %3874 = vmatprep.subr.bf16.mxu1 %v4292_v48 }
 0x27f   : > { %3859 = vmatpush3.bf16.msra.mxu0 %v4183_v37  ;;  %3875 = vmatpush3.bf16.msra.mxu1 %v4184_v38  ;;  %v4211_v37 = vld [vmem:[%s5110_s11 + $0xb0] sm:$0xff]   ;;  %v4212_v38 = vld [vmem:[%s5110_s11 + $0xb8] sm:$0xff]  }
 0x280   : > { %3860 = vmatprep.subr.bf16.mxu0 %v4292_v48  ;;  %3876 = vmatprep.subr.bf16.mxu1 %v4292_v48 }
 0x283   : > { %3861 = vmatpush3.bf16.msra.mxu0 %v4185_v39  ;;  %3877 = vmatpush3.bf16.msra.mxu1 %v4186_v40  ;;  %v4213_v39 = vld [vmem:[%s5110_s11 + $0xc0] sm:$0xff]  }
 0x284   : > { %3862 = vmatprep.subr.bf16.mxu0 %v4292_v48  ;;  %3878 = vmatprep.subr.bf16.mxu1 %v4292_v48 }
 0x287   : > { %3863 = vmatpush3.bf16.msra.mxu0 %v2222_v44  ;;  %3879 = vmatpush3.bf16.msra.mxu1 %v2313_v45  ;;  %v4216_v44 = vld [vmem:[%s5112_s13 + $0x10] sm:$0xff]   ;;  %v4217_v45 = vld [vmem:[%s5112_s13 + $0x18] sm:$0xff]  }
 0x288   : > { %3884 = vmatprep.subr.bf16.mxu0 %v4292_v48  ;;  %3890 = vmatprep.subr.bf16.mxu1 %v4292_v48 }
 0x28a   : > { %3865 = vmatmul.mubr.msk.bf16.vlgmr.msra.gmra.mrb[8].mxu0 %vm1503_vm8, %v2184_v46  ;;  %3881 = vmatmul.mubr.msk.bf16.vlgmr.msra.gmra.mrb[12].mxu1 %vm1503_vm8, %v2184_v46  ;;  %v4218_v46 = vld [vmem:[%s5112_s13 + $0x20] sm:$0xff]  }
 0x28b   : > { %3886 = vmatprep.mubr.msk.bf16.mxu0 %vm4293_vm5, %v4292_v48  ;;  %3892 = vmatprep.mubr.msk.bf16.mxu1 %vm4293_vm5, %v4292_v48 }
 0x35d   : > { %v2258_v47 = vpop.f32.mrb[8].mxu0  ;;  %v2349_v49 = vpop.f32.mrb[12].mxu1 }
 0x35e   : > { %v2358_v50 = vmax.f32 %v2258_v47, %v2349_v49  ;;  %v3866_v51 = vpop.f32.mrb[9].mxu0  ;;  %v3882_v52 = vpop.f32.mrb[13].mxu1  ;;  %v4219_v47 = vld [vmem:[%s5112_s13 + $0x28] sm:$0xff]   ;;  %v4220_v49 = vld [vmem:[%s5112_s13 + $0x30] sm:$0xff]  }
 0x35f   : > { %v2261_v53 = vpop.f32.mrb[10].mxu0  ;;  %v2352_v54 = vpop.f32.mrb[14].mxu1  ;;  %v4222_v51 = vld [vmem:[%s5114_s15] sm:$0xff]   ;;  %v4223_v52 = vld [vmem:[%s5114_s15 + $0x8] sm:$0xff]  }
 0x360   : > { %v2367_v55 = vadd.f32 %v3409_v43, %v2358_v50  ;;  %v2359_v56 = vmax.f32 %v2261_v53, %v2352_v54  ;;  %v3867_v57 = vpop.f32.mrb[11].mxu0  ;;  %v3883_v58 = vpop.f32.mrb[15].mxu1  ;;  %v4224_v53 = vld [vmem:[%s5114_s15 + $0x10] sm:$0xff]   ;;  %v4225_v54 = vld [vmem:[%s5114_s15 + $0x18] sm:$0xff]  }
 0x362   : > { %v2368_v59 = vadd.f32 %v3409_v43, %v2359_v56  ;;  %v2369_v60 = vmax.f32 %v2367_v55, 0.0  ;;  %v4221_v43 = vld [vmem:[%s5112_s13 + $0x38] ss:$0 sps:$4 sm:$0xff]  }
 0x363   : > { %v2963_v50 = vsel %vm2961_vm12, %v4221_v43, 0 }
 0x364   : > { %v2370_v61 = vmax.f32 %v2368_v59, 0.0 }
 0x366   : > { %v2371_v62 = vpack.c.bf16 %v2370_v61, %v2369_v60 }
 0x368   : > { %v2379_v63 = vsel %vm2377_vm9, %v2371_v62, 0 }
 0x369   : > { %3885 = vmatpush3.bf16.msra.mxu0 %v2379_v63  ;;  %3891 = vmatpush3.bf16.msra.mxu1 %v2379_v63 }
 0x36a   : > { %3910 = vmatprep.subr.bf16.mxu1 %v4292_v48  ;;  %3896 = vmatprep.subr.bf16.mxu0 %v4292_v48 }
 0x36c   : > { %3887 = vmatmul.mubr.msk.bf16.vlgmr.msra.gmra.mrb[12].mxu0 %vm2373_vm10, %v2372_v0  ;;  %3893 = vmatmul.mubr.msk.bf16.vlgmr.msra.gmra.mrb[16].mxu1 %vm2373_vm10, %v2421_v1 }
 0x36d   : > { %3911 = vmatpush3.bf16.msra.mxu1 %v4189_v2  ;;  %3897 = vmatpush3.bf16.msra.mxu0 %v4190_v3 }
 0x36e   : > { %3912 = vmatprep.subr.bf16.mxu1 %v4292_v48  ;;  %3898 = vmatprep.subr.bf16.mxu0 %v4292_v48 }
 0x36f   : > { %3920 = vmatprep.mubr.msk.bf16.mxu1 %vm4293_vm5, %v4292_v48  ;;  %3906 = vmatprep.mubr.msk.bf16.mxu0 %vm4293_vm5, %v4292_v48 }
 0x371   : > { %3913 = vmatpush3.bf16.msra.mxu1 %v4191_v4  ;;  %3899 = vmatpush3.bf16.msra.mxu0 %v4192_v5 }
 0x372   : > { %3914 = vmatprep.subr.bf16.mxu1 %v4292_v48  ;;  %3900 = vmatprep.subr.bf16.mxu0 %v4292_v48 }
 0x375   : > { %3915 = vmatpush3.bf16.msra.mxu1 %v4193_v6  ;;  %3901 = vmatpush3.bf16.msra.mxu0 %v4194_v7 }
 0x376   : > { %3916 = vmatprep.subr.bf16.mxu1 %v4292_v48  ;;  %3902 = vmatprep.subr.bf16.mxu0 %v4292_v48 }
 0x379   : > { %3917 = vmatpush3.bf16.msra.mxu1 %v4195_v8  ;;  %3903 = vmatpush3.bf16.msra.mxu0 %v4196_v9 }
 0x37a   : > { %3918 = vmatprep.subr.bf16.mxu1 %v4292_v48  ;;  %3904 = vmatprep.subr.bf16.mxu0 %v4292_v48 }
 0x37d   : > { %3919 = vmatpush3.bf16.msra.mxu1 %v4197_v10  ;;  %3905 = vmatpush3.bf16.msra.mxu0 %v4198_v11  ;;  %v2892_v11 = vld [vmem:[%s5111_s12] sm:$0x1] }
 0x37e   : > { %3938 = vmatprep.subr.bf16.mxu1 %v4292_v48  ;;  %3924 = vmatprep.subr.bf16.mxu0 %v4292_v48 }
 0x43f   : > { %v2415_v12 = vpop.f32.mrb[12].mxu0  ;;  %v2459_v13 = vpop.f32.mrb[16].mxu1 }
 0x440   : > { %v2465_v14 = vmax.f32 %v2415_v12, %v2459_v13  ;;  %v3888_v15 = vpop.f32.mrb[13].mxu0  ;;  %v3894_v16 = vpop.f32.mrb[17].mxu1 }
 0x441   : > { %v2418_v17 = vpop.f32.mrb[14].mxu0  ;;  %v2462_v18 = vpop.f32.mrb[18].mxu1 }
 0x442   : > { %v2466_v20 = vpack.c.bf16 %v2465_v14, %v2465_v14  ;;  %v3889_v21 = vpop.f32.mrb[15].mxu0  ;;  %v3895_v22 = vpop.f32.mrb[19].mxu1 }
 0x443   : > { %v2911_v22 = vld [vmem:[%s5113_s14] sm:$0x1] }
 0x444   : > { %v2488_v24 = vshrl.u32 %v2466_v20, 16  ;;  %3921 = vmatmul.mubr.msk.bf16.vlgmr.msra.gmra.mrb[20].mxu1 %vm2520_vm11, %v2466_v20  ;;  %v2647_v35 = vrot.slane %v2466_v20, 1  ;;  %v2817_v40 = vrot.slane %v2466_v20, 2  ;;  %v4227_v20 = vld [vmem:[%s5114_s15 + $0x28] ss:$0 sps:$4 sm:$0x33]  }
 0x445   : > { %3939 = vmatpush3.bf16.msra.mxu1 %v4199_v19  ;;  %3948 = vmatprep.mubr.msk.bf16.mxu1 %vm4293_vm5, %v4292_v48  ;;  %v4226_v19 = vld [vmem:[%s5114_s15 + $0x20] sm:$0xff]   ;;  %v3056_v21 = vsel %vm1507_vm7, %v4227_v20, 0 }
 0x446   : > { %3907 = vmatmul.mubr.msk.bf16.vlgmr.msra.gmra.mrb[16].mxu0 %vm2520_vm11, %v2488_v24  ;;  %3940 = vmatprep.subr.bf16.mxu1 %v4292_v48  ;;  %v2732_v33 = vrot.slane %v2488_v24, 1 }
 0x447   : > { %3925 = vmatpush3.bf16.msra.mxu0 %v4200_v23  ;;  %3934 = vmatprep.mubr.msk.bf16.mxu0 %vm4293_vm5, %v4292_v48 }
 0x448   : > { %3926 = vmatprep.subr.bf16.mxu0 %v4292_v48 }
 0x449   : > { %3941 = vmatpush3.bf16.msra.mxu1 %v4201_v25 }
 0x44a   : > { %3942 = vmatprep.subr.bf16.mxu1 %v4292_v48 }
 0x44b   : > { %3927 = vmatpush3.bf16.msra.mxu0 %v4202_v26 }
 0x44c   : > { %3928 = vmatprep.subr.bf16.mxu0 %v4292_v48 }
 0x44d   : > { %3943 = vmatpush3.bf16.msra.mxu1 %v4203_v27 }
 0x44e   : > { %3944 = vmatprep.subr.bf16.mxu1 %v4292_v48 }
 0x44f   : > { %3929 = vmatpush3.bf16.msra.mxu0 %v4204_v28 }
 0x450   : > { %3930 = vmatprep.subr.bf16.mxu0 %v4292_v48 }
 0x451   : > { %3945 = vmatpush3.bf16.msra.mxu1 %v4205_v29 }
 0x452   : > { %3946 = vmatprep.subr.bf16.mxu1 %v4292_v48 }
 0x453   : > { %3931 = vmatpush3.bf16.msra.mxu0 %v4206_v30 }
 0x454   : > { %3932 = vmatprep.subr.bf16.mxu0 %v4292_v48 }
 0x455   : > { %3947 = vmatpush3.bf16.msra.mxu1 %v4207_v31 }
 0x456   : > { %3966 = vmatprep.subr.bf16.mxu1 %v4292_v48 }
 0x457   : > { %3933 = vmatpush3.bf16.msra.mxu0 %v4208_v32 }
 0x458   : > { %3949 = vmatmul.mubr.msk.bf16.vlgmr.msra.gmra.mrb[24].mxu1 %vm2520_vm11, %v2732_v33  ;;  %3952 = vmatprep.subr.bf16.mxu0 %v4292_v48 }
 0x459   : > { %3982 = vmatprep.mubr.msk.bf16.mxu1 %vm4293_vm5, %v4292_v48  ;;  %3967 = vmatpush3.bf16.msra.mxu1 %v4214_v41 }
 0x45a   : > { %3935 = vmatmul.mubr.msk.bf16.vlgmr.msra.gmra.mrb[20].mxu0 %vm2520_vm11, %v2647_v35  ;;  %3968 = vmatprep.subr.bf16.mxu1 %v4292_v48 }
 0x45b   : > { %3953 = vmatpush3.bf16.msra.mxu0 %v4209_v34  ;;  %3962 = vmatprep.mubr.msk.bf16.mxu0 %vm4293_vm5, %v4292_v48 }
 0x45c   : > { %3954 = vmatprep.subr.bf16.mxu0 %v4292_v48 }
 0x45d   : > { %3969 = vmatpush3.bf16.msra.mxu1 %v4215_v42 }
 0x45e   : > { %3970 = vmatprep.subr.bf16.mxu1 %v4292_v48 }
 0x45f   : > { %3955 = vmatpush3.bf16.msra.mxu0 %v4210_v36 }
 0x460   : > { %3956 = vmatprep.subr.bf16.mxu0 %v4292_v48 }
 0x461   : > { %3971 = vmatpush3.bf16.msra.mxu1 %v4216_v44 }
 0x462   : > { %3972 = vmatprep.subr.bf16.mxu1 %v4292_v48 }
 0x463   : > { %3957 = vmatpush3.bf16.msra.mxu0 %v4211_v37 }
 0x464   : > { %3958 = vmatprep.subr.bf16.mxu0 %v4292_v48 }
 0x465   : > { %3973 = vmatpush3.bf16.msra.mxu1 %v4217_v45 }
 0x466   : > { %3974 = vmatprep.subr.bf16.mxu1 %v4292_v48 }
 0x467   : > { %3959 = vmatpush3.bf16.msra.mxu0 %v4212_v38 }
 0x468   : > { %3960 = vmatprep.subr.bf16.mxu0 %v4292_v48 }
 0x469   : > { %3975 = vmatpush3.bf16.msra.mxu1 %v4218_v46 }
 0x46a   : > { %3976 = vmatprep.subr.bf16.mxu1 %v4292_v48 }
 0x46b   : > { %3961 = vmatpush3.bf16.msra.mxu0 %v4213_v39 }
 0x46c   : > { %3986 = vmatprep.subr.bf16.mxu0 %v4292_v48 }
 0x46d   : > { %3977 = vmatpush3.bf16.msra.mxu1 %v4219_v47 }
 0x46e   : > { %3963 = vmatmul.mubr.msk.bf16.vlgmr.msra.gmra.mrb[24].mxu0 %vm2520_vm11, %v2817_v40  ;;  %3978 = vmatprep.subr.bf16.mxu1 %v4292_v48 }
 0x46f   : > { %3998 = vmatprep.mubr.msk.bf16.mxu0 %vm4293_vm5, %v4292_v48  ;;  %3987 = vmatpush3.bf16.msra.mxu0 %v4222_v51 }
 0x470   : > { %3988 = vmatprep.subr.bf16.mxu0 %v4292_v48 }
 0x471   : > { %3979 = vmatpush3.bf16.msra.mxu1 %v4220_v49 }
 0x472   : > { %3980 = vmatprep.subr.bf16.mxu1 %v4292_v48 }
 0x473   : > { %3989 = vmatpush3.bf16.msra.mxu0 %v4223_v52 }
 0x474   : > { %3990 = vmatprep.subr.bf16.mxu0 %v4292_v48 }
 0x475   : > { %3981 = vmatpush3.bf16.msra.mxu1 %v2963_v50 }
 0x477   : > { %3991 = vmatpush3.bf16.msra.mxu0 %v4224_v53 }
 0x478   : > { %3992 = vmatprep.subr.bf16.mxu0 %v4292_v48 }
 0x47b   : > { %3993 = vmatpush3.bf16.msra.mxu0 %v4225_v54 }
 0x47c   : > { %3994 = vmatprep.subr.bf16.mxu0 %v4292_v48 }
 0x47f   : > { %3995 = vmatpush3.bf16.msra.mxu0 %v4226_v19 }
 0x480   : > { %3996 = vmatprep.subr.bf16.mxu0 %v4292_v48  ;;  %v3018_v48 = vld [vmem:[%s5115_s16] sm:$0x1] }
 0x483   : > { %3997 = vmatpush3.bf16.msra.mxu0 %v3056_v21 }
 0x517   : > { %v2630_v55 = vpop.f32.mrb[20].mxu1 }
 0x518   : > { %v3922_v56 = vpop.f32.mrb[21].mxu1 }
 0x519   : > { %v2558_v57 = vpop.f32.mrb[16].mxu0  ;;  %v2633_v58 = vpop.f32.mrb[22].mxu1 }
 0x51a   : > { %v2631_v59 = vadd.f32 %v2630_v55, %v2558_v57  ;;  %v3908_v60 = vpop.f32.mrb[17].mxu0  ;;  %v3923_v61 = vpop.f32.mrb[23].mxu1 }
 0x51b   : > { %v2561_v62 = vpop.f32.mrb[18].mxu0 }
 0x51c   : > { %v3909_v63 = vpop.f32.mrb[19].mxu0 }
 0x52b   : > { %v2800_v0 = vpop.f32.mrb[24].mxu1 }
 0x52c   : > { %v3950_v1 = vpop.f32.mrb[25].mxu1 }
 0x52d   : > { %v2715_v2 = vpop.f32.mrb[20].mxu0  ;;  %v2803_v3 = vpop.f32.mrb[26].mxu1 }
 0x52e   : > { %v2721_v4 = vadd.f32 %v2715_v2, %v2631_v59  ;;  %v3936_v5 = vpop.f32.mrb[21].mxu0  ;;  %v3951_v6 = vpop.f32.mrb[27].mxu1 }
 0x52f   : > { %v2718_v7 = vpop.f32.mrb[22].mxu0 }
 0x530   : > { %v3937_v8 = vpop.f32.mrb[23].mxu0  ;;  %v2806_v9 = vadd.f32 %v2800_v0, %v2721_v4 }
 0x541   : > { %v2885_v10 = vpop.f32.mrb[24].mxu0 }
 0x542   : > { %v2891_v12 = vadd.f32 %v2885_v10, %v2806_v9  ;;  %v3964_v13 = vpop.f32.mrb[25].mxu0 }
 0x543   : > { %v2888_v14 = vpop.f32.mrb[26].mxu0 }
 0x544   : > { %v2893_v15 = vadd.f32 %v2892_v11, %v2891_v12  ;;  %v3965_v16 = vpop.f32.mrb[27].mxu0 }
 0x546   : > { %v2894_v17 = vmax.f32 %v2893_v15, 0.0 }
 0x548   : > { %v2895_v18 = vpack.c.bf16 %v2894_v17, %v2894_v17 }
 0x54a   : > { %3983 = vmatmul.mubr.msk.bf16.vlgmr.msra.gmra.mrb[28].mxu1 %vm2957_vm13, %v2895_v18 }
 0x61d   : > { %v2999_v23 = vpop.f32.mrb[28].mxu1 }
 0x61e   : > { %v3000_v24 = vadd.f32 %v2999_v23, %v2911_v22  ;;  %v3984_v25 = vpop.f32.mrb[29].mxu1 }
 0x61f   : > { %v3002_v26 = vpop.f32.mrb[30].mxu1 }
 0x620   : > { %v3005_v27 = vmax.f32 %v3000_v24, 0.0  ;;  %v3985_v28 = vpop.f32.mrb[31].mxu1 }
 0x622   : > { %v3006_v29 = vpack.c.bf16 %v3005_v27, %v3005_v27 }
 0x624   : > { %3999 = vmatmul.mubr.msk.bf16.vlgmr.msra.gmra.mrb[28].mxu0 %vm1503_vm8, %v3006_v29 }
 0x6f7   : > { %v3092_v30 = vpop.f32.mrb[28].mxu0 }
 0x6f8   : > { %v3093_v31 = vadd.f32 %v3092_v30, %v3018_v48  ;;  %v4000_v32 = vpop.f32.mrb[29].mxu0 }
 0x6f9   : > { %v3095_v33 = vpop.f32.mrb[30].mxu0 }
 0x6fa   : > { %v4001_v34 = vpop.f32.mrb[31].mxu0  ;;  %3099 = vst.msk [vmem:[%s540_s21] sm:$0x1] %vm3098_vm14, %v3093_v31 }
 0x6fb   : > { %4241 = shalt.err (!%p4238_p3)
}
 0x6fc   : > { %s4242_s17 = scalar_lea.hbm %s5057_s24, 16  ;;  %s4246_s30 = scalar_lea.hbm %s5139_s0, 32 }
 0x6fd   : > { %p4243_p4 = scmp.ne.s32.totalorder %s5057_s24, %s4242_s17  ;;  %p4247_p9 = scmp.lt.u32.totalorder %s5057_s24, %s5139_s0 }
 0x6fe   : > { %p4248_p10 = scmp.lt.u32.totalorder %s4246_s30, %s4242_s17  ;;  %p4250_p12 = scmp.lt.u32.totalorder %s4242_s17, %s5057_s24 }
 0x6ff   : > { %p4244_p7 = pnand %p4243_p4, %p4423_p5 }
 0x700   : > { %p4249_p11 = por %p4248_p10, %p4247_p9 }
 0x701   : > { %p4245_p8 = pneg %p4244_p7 }
 0x702   : > { %p4251_p13 = por %p4250_p12, %p4249_p11 }
 0x704   : > { %p4252_p0 = pnand %p4251_p13, %p4245_p8 }
 0x706   : > { %4255 = shalt.err (!%p4252_p0)
}
 0x707   : > { %4066 = dma.vmem_to_hbm [thread:$0]  (%p4423_p5), %s5059_s22, 16, %s5057_s24, %s3101_s28  }
 0x708 PF: > { %s5140_s19 = sld [smem:[#allocation7_spill]]  ;;  %s5141_s20 = sld [smem:[#allocation5_spill]] }
 0x70e   : > { %p4072_p1 = scmp.ge.s32.totalorder %s5140_s19, 2  ;;  %s3125_s18 = sand.u32 1, %s5141_s20  }
 0x70f   : > { %s3126_s21 = scalar_lea.sflag [#allocation3], %s3125_s18 }
 0x710   : > { %p4069_p2 = pnand %p4072_p1, %p4427_p6 }
 0x712   : > { %4273 = dma.done.wait (!%p4069_p2), %s3126_s21, 16  }
 0x713   : > { %4275 = vsyncadd (!%p4069_p2), %s3126_s21, 4294967280  ;;  %s5143_s27 = sld [smem:[#allocation8_spill]]  ;;  %s5144_s17 = sld [smem:[#allocation6_spill]] }
 0x714   : > { %s5145_s26 = sld [smem:[#allocation9_spill]]  ;;  %s5146_s24 = smov %s4282_s25 }
 0x719   : > { %p27_p3 = scmp.ge.s32.totalorder %s5143_s27, 4   ;;  %s5147_s25 = smov %s5144_s17 }
 0x71b   :  { %29 = sbr.rel (!%p27_p3) target bundleno = 7 (0x7), region = 139 }
 0x722   :  { %3130 = vsyncpa [#allocation3], 1 }
 0x723   :  { %3132 = vsyncpa [#allocation3 + $0x1], 1 }

</bundles_post_ra>
